<compile_context>
chip_gen: v7x
topology: tpu7x:2x2x1
jax: 0.10.0
libtpu: 0.0.40
codegen_flags: <defaults>
</compile_context>

<pallas_src>
import functools

import jax
import jax.numpy as jnp
from jax import lax
from jax.experimental import pallas as pl
from jax.experimental.pallas import tpu as pltpu

LANE = 128      # gate-pack / FC-output lane width
SUBLANE = 8     # batch padded to a multiple of 8 rows (f32 sublane count)


def _round_up(x, m):
    return ((x + m - 1) // m) * m


# -----------------------------------------------------------------------------
# Fused kernel: all GRU layers (wavefront-interleaved) + final Linear
# -----------------------------------------------------------------------------
def _make_fused_gru_kernel(T, Bp, H, num_layers):
    """Kernel VMEM refs (whole arrays):
       x_ref  : (T*Bp, Ip)  bf16   time-major rows (row = t*Bp + b)
       wih0   : (Ip, GW)    bf16   layer-0 input weights, gate slots [r|z|n|0]
       whh0   : (H,  GW)    bf16   layer-0 recurrent weights, slots [r|z|0|n]
       b0     : (1,  GW)    f32    [bih_r+bhh_r | bih_z+bhh_z | bih_n | bhh_n]
       per layer l>=1: W_l (2H, GW) bf16 stacked [wih_l ; whh_l], b_l (1, GW) f32
       wfc (H, Op) bf16, bfc (1, Op) f32
       out_ref (Bp, Op) f32
    """

    def gate_step(g, h_prev):
        # g slots: [pre_r | pre_z | gi_n(+bih_n) | gh_n(+bhh_n)]
        rz = jax.nn.sigmoid(g[:, 0:2 * H])
        r = rz[:, 0:H]
        z = rz[:, H:2 * H]
        n = jnp.tanh(g[:, 2 * H:3 * H] + r * g[:, 3 * H:4 * H])
        return n + z * (h_prev - n)          # == (1-z)*n + z*h

    def kernel(x_ref, *refs):
        wih0_ref, whh0_ref, b0_ref = refs[0], refs[1], refs[2]
        lrefs = refs[3:3 + 2 * (num_layers - 1)]
        wfc_ref, bfc_ref, out_ref = refs[3 + 2 * (num_layers - 1):]

        # Hoisted layer-0 input projection: one big MXU matmul; bih (+ bhh_r/z,
        # and bhh_n into slot 3 -- slot-3 weight columns are zero) folded in once.
        gi0 = (
            jnp.dot(x_ref[...], wih0_ref[...], preferred_element_type=jnp.float32)
            + b0_ref[...]
        )                                               # (T*Bp, GW) f32

        whh0 = whh0_ref[...]
        w_up = [lrefs[2 * i][...] for i in range(num_layers - 1)]
        b_up = [lrefs[2 * i + 1][...] for i in range(num_layers - 1)]

        hs = [jnp.zeros((Bp, H), jnp.float32) for _ in range(num_layers)]

        # Fully unrolled wavefront time loop (T static, small): all slices are
        # static 8-sublane-aligned views; layer l>=1 at step t only needs
        # h_{l-1,t}, so the serial chain is ~T+num_layers cell latencies.
        for t in range(T):
            # layer 0: one (Bp,H)@(H,128) recurrent matmul per step
            g0 = gi0[t * Bp:(t + 1) * Bp, :] + jnp.dot(
                hs[0].astype(jnp.bfloat16), whh0,
                preferred_element_type=jnp.float32)
            hs[0] = gate_step(g0, hs[0])
            # layers >= 1: gi+gh fused via K-concat [h_below ; h_prev] (K=2H)
            for l in range(1, num_layers):
                xin = jnp.concatenate([hs[l - 1], hs[l]], axis=1)
                gl = jnp.dot(xin.astype(jnp.bfloat16), w_up[l - 1],
                             preferred_element_type=jnp.float32) + b_up[l - 1]
                hs[l] = gate_step(gl, hs[l])
            # TODO(synk): inter-layer dropout (training mode) not applied -- eval
            # semantics (Dropout is identity at inference).

        # Final FC on the last hidden state only; (Bp, Op) unmasked 128-lane store.
        out_ref[...] = (
            jnp.dot(hs[-1].astype(jnp.bfloat16), wfc_ref[...],
                    preferred_element_type=jnp.float32)
            + bfc_ref[...]
        )

    return kernel


# -----------------------------------------------------------------------------
# Wrapper
# -----------------------------------------------------------------------------
@functools.partial(
    jax.jit, static_argnames=("hidden_size", "num_layers", "output_size")
)
def gru_model_forward(x, kparams, *, hidden_size, num_layers, output_size):
    """Eval-mode forward equivalent to GRUModel.forward.

    x: (B, T, input_size) float32, batch-first. Returns (B, output_size) float32.
    """
    B, T, I = x.shape
    H = hidden_size
    Bp = _round_up(max(B, SUBLANE), SUBLANE)
    Op = _round_up(output_size, LANE)
    Ip = kparams["l0"]["wih"].shape[0]            # feature dim padded at prep time

    # time-major + batch/feature padding + flat (T*Bp, Ip) slab for the hoisted matmul.
    xt = jnp.transpose(x, (1, 0, 2))                          # (T, B, I)
    xt = jnp.pad(xt, ((0, 0), (0, Bp - B), (0, Ip - I)))      # (T, Bp, Ip)
    x2d = xt.reshape(T * Bp, Ip).astype(jnp.bfloat16)

    flat = [x2d, kparams["l0"]["wih"], kparams["l0"]["whh"], kparams["l0"]["b"]]
    for p in kparams["layers"]:
        flat += [p["w"], p["b"]]
    flat += [kparams["fc"]["w"], kparams["fc"]["b"]]

    kernel = _make_fused_gru_kernel(T, Bp, H, num_layers)
    vmem = pl.BlockSpec(memory_space=pltpu.MemorySpace.VMEM)
    out = pl.pallas_call(
        kernel,
        out_shape=jax.ShapeDtypeStruct((Bp, Op), jnp.float32),
        in_specs=[vmem] * len(flat),
        out_specs=vmem,
        # TODO(synk): for production-scale B add a batch grid with
        # dimension_semantics=("parallel",) (v7x 2-TC sharding); for very large T
        # chunk the hoisted gi0 projection over T-blocks (emit_pipeline) to stay
        # inside v7x's 64 MiB VMEM.
    )(*flat)
    return out[:B, :output_size]


# -----------------------------------------------------------------------------
# Parameters: raw (PyTorch layout) + kernel-layout preparation
# -----------------------------------------------------------------------------
def init_params(key, input_size, hidden_size, num_layers, output_size):
    """PyTorch-default init U(-1/sqrt(H), 1/sqrt(H)), PyTorch weight layout."""
    k = 1.0 / jnp.sqrt(jnp.asarray(hidden_size, jnp.float32))
    params = {"gru": []}
    for layer in range(num_layers):
        in_sz = input_size if layer == 0 else hidden_size
        key, k1, k2, k3, k4 = jax.random.split(key, 5)
        params["gru"].append({
            "wih": jax.random.uniform(k1, (3 * hidden_size, in_sz), jnp.float32, -k, k),
            "whh": jax.random.uniform(k2, (3 * hidden_size, hidden_size), jnp.float32, -k, k),
            "bih": jax.random.uniform(k3, (3 * hidden_size,), jnp.float32, -k, k),
            "bhh": jax.random.uniform(k4, (3 * hidden_size,), jnp.float32, -k, k),
        })
    key, k5, k6 = jax.random.split(key, 3)
    params["fc"] = {
        "w": jax.random.uniform(k5, (output_size, hidden_size), jnp.float32, -k, k),
        "b": jax.random.uniform(k6, (output_size,), jnp.float32, -k, k),
    }
    return params


def _pack_bias(bih, bhh, H, GW):
    """4-slot packed bias: [bih_r+bhh_r | bih_z+bhh_z | bih_n | bhh_n]."""
    b = jnp.zeros((1, GW), jnp.float32)
    b = b.at[0, 0:H].set(bih[0:H] + bhh[0:H])
    b = b.at[0, H:2 * H].set(bih[H:2 * H] + bhh[H:2 * H])
    b = b.at[0, 2 * H:3 * H].set(bih[2 * H:3 * H])
    b = b.at[0, 3 * H:4 * H].set(bhh[2 * H:3 * H])
    return b


def prepare_params(raw, input_size, hidden_size, num_layers, output_size):
    """Kernel layout: 4-slot gate packing in one 128-lane block, bf16 weights."""
    H = hidden_size
    GW = _round_up(4 * H, LANE)
    Ip = _round_up(max(input_size, SUBLANE), SUBLANE)
    Op = _round_up(output_size, LANE)

    # --- layer 0: hoisted input projection weight [r|z|n|0], recurrent [r|z|0|n]
    p0 = raw["gru"][0]
    wih_t = p0["wih"].T                                       # (I, 3H)
    whh_t = p0["whh"].T                                       # (H, 3H)
    wih0 = jnp.zeros((Ip, GW), jnp.float32)
    wih0 = wih0.at[:input_size, 0:H].set(wih_t[:, 0:H])
    wih0 = wih0.at[:input_size, H:2 * H].set(wih_t[:, H:2 * H])
    wih0 = wih0.at[:input_size, 2 * H:3 * H].set(wih_t[:, 2 * H:3 * H])
    whh0 = jnp.zeros((H, GW), jnp.float32)
    whh0 = whh0.at[:, 0:H].set(whh_t[:, 0:H])
    whh0 = whh0.at[:, H:2 * H].set(whh_t[:, H:2 * H])
    whh0 = whh0.at[:, 3 * H:4 * H].set(whh_t[:, 2 * H:3 * H])
    b0 = _pack_bias(p0["bih"], p0["bhh"], H, GW)

    # --- layers >= 1: stacked [wih ; whh] for the K-concat matmul
    layers = []
    for l in range(1, num_layers):
        p = raw["gru"][l]
        wih_t = p["wih"].T                                    # (H, 3H)
        whh_t = p["whh"].T                                    # (H, 3H)
        W = jnp.zeros((2 * H, GW), jnp.float32)
        W = W.at[0:H, 0:H].set(wih_t[:, 0:H])
        W = W.at[0:H, H:2 * H].set(wih_t[:, H:2 * H])
        W = W.at[0:H, 2 * H:3 * H].set(wih_t[:, 2 * H:3 * H])
        W = W.at[H:2 * H, 0:H].set(whh_t[:, 0:H])
        W = W.at[H:2 * H, H:2 * H].set(whh_t[:, H:2 * H])
        W = W.at[H:2 * H, 3 * H:4 * H].set(whh_t[:, 2 * H:3 * H])
        b = _pack_bias(p["bih"], p["bhh"], H, GW)
        layers.append({"w": W.astype(jnp.bfloat16), "b": b})

    wfc = jnp.zeros((H, Op), jnp.float32).at[:, :output_size].set(raw["fc"]["w"].T)
    bfc = jnp.zeros((1, Op), jnp.float32).at[0, :output_size].set(raw["fc"]["b"])

    return {
        "l0": {"wih": wih0.astype(jnp.bfloat16),
               "whh": whh0.astype(jnp.bfloat16),
               "b": b0},
        "layers": layers,
        "fc": {"w": wfc.astype(jnp.bfloat16), "b": bfc},
    }


# -----------------------------------------------------------------------------
# Pure-JAX f32 reference (mirrors torch.nn.GRU equations) for correctness check
# -----------------------------------------------------------------------------
def reference_forward(x, raw, hidden_size, num_layers):
    B = x.shape[0]
    H = hidden_size
    h_seq = x  # (B, T, I)
    for layer in range(num_layers):
        p = raw["gru"][layer]
        wih_t, whh_t = p["wih"].T, p["whh"].T
        bih, bhh = p["bih"], p["bhh"]

        def cell(h, x_t, wih_t=wih_t, whh_t=whh_t, bih=bih, bhh=bhh):
            gi = x_t @ wih_t + bih
            gh = h @ whh_t + bhh
            r = jax.nn.sigmoid(gi[:, :H] + gh[:, :H])
            z = jax.nn.sigmoid(gi[:, H:2 * H] + gh[:, H:2 * H])
            n = jnp.tanh(gi[:, 2 * H:] + r * gh[:, 2 * H:])
            h_new = (1.0 - z) * n + z * h
            return h_new, h_new

        h0 = jnp.zeros((B, H), jnp.float32)
        _, outs = lax.scan(cell, h0, jnp.transpose(h_seq, (1, 0, 2)))
        h_seq = jnp.transpose(outs, (1, 0, 2))
    last = h_seq[:, -1, :]
    return last @ raw["fc"]["w"].T + raw["fc"]["b"]


# -----------------------------------------------------------------------------
if __name__ == "__main__":
    batch = 2
    seq_len = 8
    input_size = 4
    hidden_size = 32
    num_layers = 2
    output_size = 1
    dropout_rate = 0.2  # identity at eval/inference

    root = jax.random.PRNGKey(0)
    k_params, k_x = jax.random.split(root)
    raw = init_params(k_params, input_size, hidden_size, num_layers, output_size)
    kparams = prepare_params(raw, input_size, hidden_size, num_layers, output_size)
    x = jax.random.normal(k_x, (batch, seq_len, input_size), jnp.float32)

    out = gru_model_forward(
        x, kparams, hidden_size=hidden_size, num_layers=num_layers,
        output_size=output_size,
    )
    out = jax.block_until_ready(out)

    ref = reference_forward(x, raw, hidden_size, num_layers)
    assert out.shape == (batch, output_size)
    # bf16 MXU inputs (f32 accumulation / f32 gate math) -> loosened tolerance vs
    # the f32 reference; keep Whh/FC in f32 if tighter parity is ever required.
    assert jnp.allclose(out, ref, atol=3e-2, rtol=3e-2), (out, ref)

    print("KERNEL_OK")
</pallas_src>

<mosaic_0001>
module attributes {stable_mosaic.version = 11 : i64} {
  func.func @kernel(%arg0: memref<64x8xbf16, #tpu.memory_space<vmem>>, %arg1: memref<8x128xbf16, #tpu.memory_space<vmem>>, %arg2: memref<32x128xbf16, #tpu.memory_space<vmem>>, %arg3: memref<1x128xf32, #tpu.memory_space<vmem>>, %arg4: memref<64x128xbf16, #tpu.memory_space<vmem>>, %arg5: memref<1x128xf32, #tpu.memory_space<vmem>>, %arg6: memref<32x128xbf16, #tpu.memory_space<vmem>>, %arg7: memref<1x128xf32, #tpu.memory_space<vmem>>, %arg8: memref<8x128xf32, #tpu.memory_space<vmem>>) attributes {dimension_semantics = [], scalar_prefetch = 0 : i64, scratch_operands = 0 : i64, tpu.core_type = #tpu.core_type<tc>} {
    %c0 = arith.constant 0 : index
    %c0_0 = arith.constant 0 : index
    %0 = vector.load %arg0[%c0, %c0_0] : memref<64x8xbf16, #tpu.memory_space<vmem>>, vector<64x8xbf16>
    %c0_1 = arith.constant 0 : index
    %c0_2 = arith.constant 0 : index
    %1 = vector.load %arg1[%c0_1, %c0_2] : memref<8x128xbf16, #tpu.memory_space<vmem>>, vector<8x128xbf16>
    %cst = arith.constant dense<0.000000e+00> : vector<64x128xf32>
    %2 = tpu.matmul %0, %1, %cst {dimension_numbers = #tpu.dot_dimension_numbers<[1], [0], [0], [1], [0, 0, 1, 1], [], []>} : vector<64x8xbf16>, vector<8x128xbf16>, vector<64x128xf32> -> vector<64x128xf32>
    %c0_3 = arith.constant 0 : index
    %c0_4 = arith.constant 0 : index
    %3 = vector.load %arg3[%c0_3, %c0_4] : memref<1x128xf32, #tpu.memory_space<vmem>>, vector<1x128xf32>
    %4 = vector.broadcast %3 : vector<1x128xf32> to vector<64x128xf32>
    %5 = arith.addf %2, %4 : vector<64x128xf32>
    %c0_5 = arith.constant 0 : index
    %c0_6 = arith.constant 0 : index
    %6 = vector.load %arg2[%c0_5, %c0_6] : memref<32x128xbf16, #tpu.memory_space<vmem>>, vector<32x128xbf16>
    %c0_7 = arith.constant 0 : index
    %c0_8 = arith.constant 0 : index
    %7 = vector.load %arg4[%c0_7, %c0_8] : memref<64x128xbf16, #tpu.memory_space<vmem>>, vector<64x128xbf16>
    %c0_9 = arith.constant 0 : index
    %c0_10 = arith.constant 0 : index
    %8 = vector.load %arg5[%c0_9, %c0_10] : memref<1x128xf32, #tpu.memory_space<vmem>>, vector<1x128xf32>
    %cst_11 = arith.constant 0.000000e+00 : f32
    %9 = vector.broadcast %cst_11 : f32 to vector<8x32xf32>
    %cst_12 = arith.constant 0.000000e+00 : f32
    %10 = vector.broadcast %cst_12 : f32 to vector<8x32xf32>
    %11 = vector.extract_strided_slice %5 {offsets = [0, 0], sizes = [8, 128], strides = [1, 1]} : vector<64x128xf32> to vector<8x128xf32>
    %12 = arith.truncf %9 : vector<8x32xf32> to vector<8x32xbf16>
    %cst_13 = arith.constant dense<0.000000e+00> : vector<8x128xf32>
    %13 = tpu.matmul %12, %6, %cst_13 {dimension_numbers = #tpu.dot_dimension_numbers<[1], [0], [0], [1], [0, 0, 1, 1], [], []>} : vector<8x32xbf16>, vector<32x128xbf16>, vector<8x128xf32> -> vector<8x128xf32>
    %14 = arith.addf %11, %13 : vector<8x128xf32>
    %15 = vector.extract_strided_slice %14 {offsets = [0, 0], sizes = [8, 64], strides = [1, 1]} : vector<8x128xf32> to vector<8x64xf32>
    %16 = arith.negf %15 : vector<8x64xf32>
    %17 = math.exp %16 : vector<8x64xf32>
    %cst_14 = arith.constant 1.000000e+00 : f32
    %18 = vector.broadcast %cst_14 : f32 to vector<8x64xf32>
    %19 = arith.addf %18, %17 : vector<8x64xf32>
    %20 = arith.divf %18, %19 : vector<8x64xf32>
    %21 = vector.extract_strided_slice %20 {offsets = [0, 0], sizes = [8, 32], strides = [1, 1]} : vector<8x64xf32> to vector<8x32xf32>
    %22 = vector.extract_strided_slice %20 {offsets = [0, 32], sizes = [8, 32], strides = [1, 1]} : vector<8x64xf32> to vector<8x32xf32>
    %23 = vector.extract_strided_slice %14 {offsets = [0, 64], sizes = [8, 32], strides = [1, 1]} : vector<8x128xf32> to vector<8x32xf32>
    %24 = vector.extract_strided_slice %14 {offsets = [0, 96], sizes = [8, 32], strides = [1, 1]} : vector<8x128xf32> to vector<8x32xf32>
    %25 = arith.mulf %21, %24 : vector<8x32xf32>
    %26 = arith.addf %23, %25 : vector<8x32xf32>
    %27 = math.tanh %26 : vector<8x32xf32>
    %28 = arith.subf %9, %27 : vector<8x32xf32>
    %29 = arith.mulf %22, %28 : vector<8x32xf32>
    %30 = arith.addf %27, %29 : vector<8x32xf32>
    %31 = tpu.concatenate %30, %10 in 1 : vector<8x32xf32>, vector<8x32xf32> -> vector<8x64xf32>
    %32 = arith.truncf %31 : vector<8x64xf32> to vector<8x64xbf16>
    %cst_15 = arith.constant dense<0.000000e+00> : vector<8x128xf32>
    %33 = tpu.matmul %32, %7, %cst_15 {dimension_numbers = #tpu.dot_dimension_numbers<[1], [0], [0], [1], [0, 0, 1, 1], [], []>} : vector<8x64xbf16>, vector<64x128xbf16>, vector<8x128xf32> -> vector<8x128xf32>
    %34 = vector.broadcast %8 : vector<1x128xf32> to vector<8x128xf32>
    %35 = arith.addf %33, %34 : vector<8x128xf32>
    %36 = vector.extract_strided_slice %35 {offsets = [0, 0], sizes = [8, 64], strides = [1, 1]} : vector<8x128xf32> to vector<8x64xf32>
    %37 = arith.negf %36 : vector<8x64xf32>
    %38 = math.exp %37 : vector<8x64xf32>
    %cst_16 = arith.constant 1.000000e+00 : f32
    %39 = vector.broadcast %cst_16 : f32 to vector<8x64xf32>
    %40 = arith.addf %39, %38 : vector<8x64xf32>
    %41 = arith.divf %39, %40 : vector<8x64xf32>
    %42 = vector.extract_strided_slice %41 {offsets = [0, 0], sizes = [8, 32], strides = [1, 1]} : vector<8x64xf32> to vector<8x32xf32>
    %43 = vector.extract_strided_slice %41 {offsets = [0, 32], sizes = [8, 32], strides = [1, 1]} : vector<8x64xf32> to vector<8x32xf32>
    %44 = vector.extract_strided_slice %35 {offsets = [0, 64], sizes = [8, 32], strides = [1, 1]} : vector<8x128xf32> to vector<8x32xf32>
    %45 = vector.extract_strided_slice %35 {offsets = [0, 96], sizes = [8, 32], strides = [1, 1]} : vector<8x128xf32> to vector<8x32xf32>
    %46 = arith.mulf %42, %45 : vector<8x32xf32>
    %47 = arith.addf %44, %46 : vector<8x32xf32>
    %48 = math.tanh %47 : vector<8x32xf32>
    %49 = arith.subf %10, %48 : vector<8x32xf32>
    %50 = arith.mulf %43, %49 : vector<8x32xf32>
    %51 = arith.addf %48, %50 : vector<8x32xf32>
    %52 = vector.extract_strided_slice %5 {offsets = [8, 0], sizes = [8, 128], strides = [1, 1]} : vector<64x128xf32> to vector<8x128xf32>
    %53 = arith.truncf %30 : vector<8x32xf32> to vector<8x32xbf16>
    %cst_17 = arith.constant dense<0.000000e+00> : vector<8x128xf32>
    %54 = tpu.matmul %53, %6, %cst_17 {dimension_numbers = #tpu.dot_dimension_numbers<[1], [0], [0], [1], [0, 0, 1, 1], [], []>} : vector<8x32xbf16>, vector<32x128xbf16>, vector<8x128xf32> -> vector<8x128xf32>
    %55 = arith.addf %52, %54 : vector<8x128xf32>
    %56 = vector.extract_strided_slice %55 {offsets = [0, 0], sizes = [8, 64], strides = [1, 1]} : vector<8x128xf32> to vector<8x64xf32>
    %57 = arith.negf %56 : vector<8x64xf32>
    %58 = math.exp %57 : vector<8x64xf32>
    %cst_18 = arith.constant 1.000000e+00 : f32
    %59 = vector.broadcast %cst_18 : f32 to vector<8x64xf32>
    %60 = arith.addf %59, %58 : vector<8x64xf32>
    %61 = arith.divf %59, %60 : vector<8x64xf32>
    %62 = vector.extract_strided_slice %61 {offsets = [0, 0], sizes = [8, 32], strides = [1, 1]} : vector<8x64xf32> to vector<8x32xf32>
    %63 = vector.extract_strided_slice %61 {offsets = [0, 32], sizes = [8, 32], strides = [1, 1]} : vector<8x64xf32> to vector<8x32xf32>
    %64 = vector.extract_strided_slice %55 {offsets = [0, 64], sizes = [8, 32], strides = [1, 1]} : vector<8x128xf32> to vector<8x32xf32>
    %65 = vector.extract_strided_slice %55 {offsets = [0, 96], sizes = [8, 32], strides = [1, 1]} : vector<8x128xf32> to vector<8x32xf32>
    %66 = arith.mulf %62, %65 : vector<8x32xf32>
    %67 = arith.addf %64, %66 : vector<8x32xf32>
    %68 = math.tanh %67 : vector<8x32xf32>
    %69 = arith.subf %30, %68 : vector<8x32xf32>
    %70 = arith.mulf %63, %69 : vector<8x32xf32>
    %71 = arith.addf %68, %70 : vector<8x32xf32>
    %72 = tpu.concatenate %71, %51 in 1 : vector<8x32xf32>, vector<8x32xf32> -> vector<8x64xf32>
    %73 = arith.truncf %72 : vector<8x64xf32> to vector<8x64xbf16>
    %cst_19 = arith.constant dense<0.000000e+00> : vector<8x128xf32>
    %74 = tpu.matmul %73, %7, %cst_19 {dimension_numbers = #tpu.dot_dimension_numbers<[1], [0], [0], [1], [0, 0, 1, 1], [], []>} : vector<8x64xbf16>, vector<64x128xbf16>, vector<8x128xf32> -> vector<8x128xf32>
    %75 = vector.broadcast %8 : vector<1x128xf32> to vector<8x128xf32>
    %76 = arith.addf %74, %75 : vector<8x128xf32>
    %77 = vector.extract_strided_slice %76 {offsets = [0, 0], sizes = [8, 64], strides = [1, 1]} : vector<8x128xf32> to vector<8x64xf32>
    %78 = arith.negf %77 : vector<8x64xf32>
    %79 = math.exp %78 : vector<8x64xf32>
    %cst_20 = arith.constant 1.000000e+00 : f32
    %80 = vector.broadcast %cst_20 : f32 to vector<8x64xf32>
    %81 = arith.addf %80, %79 : vector<8x64xf32>
    %82 = arith.divf %80, %81 : vector<8x64xf32>
    %83 = vector.extract_strided_slice %82 {offsets = [0, 0], sizes = [8, 32], strides = [1, 1]} : vector<8x64xf32> to vector<8x32xf32>
    %84 = vector.extract_strided_slice %82 {offsets = [0, 32], sizes = [8, 32], strides = [1, 1]} : vector<8x64xf32> to vector<8x32xf32>
    %85 = vector.extract_strided_slice %76 {offsets = [0, 64], sizes = [8, 32], strides = [1, 1]} : vector<8x128xf32> to vector<8x32xf32>
    %86 = vector.extract_strided_slice %76 {offsets = [0, 96], sizes = [8, 32], strides = [1, 1]} : vector<8x128xf32> to vector<8x32xf32>
    %87 = arith.mulf %83, %86 : vector<8x32xf32>
    %88 = arith.addf %85, %87 : vector<8x32xf32>
    %89 = math.tanh %88 : vector<8x32xf32>
    %90 = arith.subf %51, %89 : vector<8x32xf32>
    %91 = arith.mulf %84, %90 : vector<8x32xf32>
    %92 = arith.addf %89, %91 : vector<8x32xf32>
    %93 = vector.extract_strided_slice %5 {offsets = [16, 0], sizes = [8, 128], strides = [1, 1]} : vector<64x128xf32> to vector<8x128xf32>
    %94 = arith.truncf %71 : vector<8x32xf32> to vector<8x32xbf16>
    %cst_21 = arith.constant dense<0.000000e+00> : vector<8x128xf32>
    %95 = tpu.matmul %94, %6, %cst_21 {dimension_numbers = #tpu.dot_dimension_numbers<[1], [0], [0], [1], [0, 0, 1, 1], [], []>} : vector<8x32xbf16>, vector<32x128xbf16>, vector<8x128xf32> -> vector<8x128xf32>
    %96 = arith.addf %93, %95 : vector<8x128xf32>
    %97 = vector.extract_strided_slice %96 {offsets = [0, 0], sizes = [8, 64], strides = [1, 1]} : vector<8x128xf32> to vector<8x64xf32>
    %98 = arith.negf %97 : vector<8x64xf32>
    %99 = math.exp %98 : vector<8x64xf32>
    %cst_22 = arith.constant 1.000000e+00 : f32
    %100 = vector.broadcast %cst_22 : f32 to vector<8x64xf32>
    %101 = arith.addf %100, %99 : vector<8x64xf32>
    %102 = arith.divf %100, %101 : vector<8x64xf32>
    %103 = vector.extract_strided_slice %102 {offsets = [0, 0], sizes = [8, 32], strides = [1, 1]} : vector<8x64xf32> to vector<8x32xf32>
    %104 = vector.extract_strided_slice %102 {offsets = [0, 32], sizes = [8, 32], strides = [1, 1]} : vector<8x64xf32> to vector<8x32xf32>
    %105 = vector.extract_strided_slice %96 {offsets = [0, 64], sizes = [8, 32], strides = [1, 1]} : vector<8x128xf32> to vector<8x32xf32>
    %106 = vector.extract_strided_slice %96 {offsets = [0, 96], sizes = [8, 32], strides = [1, 1]} : vector<8x128xf32> to vector<8x32xf32>
    %107 = arith.mulf %103, %106 : vector<8x32xf32>
    %108 = arith.addf %105, %107 : vector<8x32xf32>
    %109 = math.tanh %108 : vector<8x32xf32>
    %110 = arith.subf %71, %109 : vector<8x32xf32>
    %111 = arith.mulf %104, %110 : vector<8x32xf32>
    %112 = arith.addf %109, %111 : vector<8x32xf32>
    %113 = tpu.concatenate %112, %92 in 1 : vector<8x32xf32>, vector<8x32xf32> -> vector<8x64xf32>
    %114 = arith.truncf %113 : vector<8x64xf32> to vector<8x64xbf16>
    %cst_23 = arith.constant dense<0.000000e+00> : vector<8x128xf32>
    %115 = tpu.matmul %114, %7, %cst_23 {dimension_numbers = #tpu.dot_dimension_numbers<[1], [0], [0], [1], [0, 0, 1, 1], [], []>} : vector<8x64xbf16>, vector<64x128xbf16>, vector<8x128xf32> -> vector<8x128xf32>
    %116 = vector.broadcast %8 : vector<1x128xf32> to vector<8x128xf32>
    %117 = arith.addf %115, %116 : vector<8x128xf32>
    %118 = vector.extract_strided_slice %117 {offsets = [0, 0], sizes = [8, 64], strides = [1, 1]} : vector<8x128xf32> to vector<8x64xf32>
    %119 = arith.negf %118 : vector<8x64xf32>
    %120 = math.exp %119 : vector<8x64xf32>
    %cst_24 = arith.constant 1.000000e+00 : f32
    %121 = vector.broadcast %cst_24 : f32 to vector<8x64xf32>
    %122 = arith.addf %121, %120 : vector<8x64xf32>
    %123 = arith.divf %121, %122 : vector<8x64xf32>
    %124 = vector.extract_strided_slice %123 {offsets = [0, 0], sizes = [8, 32], strides = [1, 1]} : vector<8x64xf32> to vector<8x32xf32>
    %125 = vector.extract_strided_slice %123 {offsets = [0, 32], sizes = [8, 32], strides = [1, 1]} : vector<8x64xf32> to vector<8x32xf32>
    %126 = vector.extract_strided_slice %117 {offsets = [0, 64], sizes = [8, 32], strides = [1, 1]} : vector<8x128xf32> to vector<8x32xf32>
    %127 = vector.extract_strided_slice %117 {offsets = [0, 96], sizes = [8, 32], strides = [1, 1]} : vector<8x128xf32> to vector<8x32xf32>
    %128 = arith.mulf %124, %127 : vector<8x32xf32>
    %129 = arith.addf %126, %128 : vector<8x32xf32>
    %130 = math.tanh %129 : vector<8x32xf32>
    %131 = arith.subf %92, %130 : vector<8x32xf32>
    %132 = arith.mulf %125, %131 : vector<8x32xf32>
    %133 = arith.addf %130, %132 : vector<8x32xf32>
    %134 = vector.extract_strided_slice %5 {offsets = [24, 0], sizes = [8, 128], strides = [1, 1]} : vector<64x128xf32> to vector<8x128xf32>
    %135 = arith.truncf %112 : vector<8x32xf32> to vector<8x32xbf16>
    %cst_25 = arith.constant dense<0.000000e+00> : vector<8x128xf32>
    %136 = tpu.matmul %135, %6, %cst_25 {dimension_numbers = #tpu.dot_dimension_numbers<[1], [0], [0], [1], [0, 0, 1, 1], [], []>} : vector<8x32xbf16>, vector<32x128xbf16>, vector<8x128xf32> -> vector<8x128xf32>
    %137 = arith.addf %134, %136 : vector<8x128xf32>
    %138 = vector.extract_strided_slice %137 {offsets = [0, 0], sizes = [8, 64], strides = [1, 1]} : vector<8x128xf32> to vector<8x64xf32>
    %139 = arith.negf %138 : vector<8x64xf32>
    %140 = math.exp %139 : vector<8x64xf32>
    %cst_26 = arith.constant 1.000000e+00 : f32
    %141 = vector.broadcast %cst_26 : f32 to vector<8x64xf32>
    %142 = arith.addf %141, %140 : vector<8x64xf32>
    %143 = arith.divf %141, %142 : vector<8x64xf32>
    %144 = vector.extract_strided_slice %143 {offsets = [0, 0], sizes = [8, 32], strides = [1, 1]} : vector<8x64xf32> to vector<8x32xf32>
    %145 = vector.extract_strided_slice %143 {offsets = [0, 32], sizes = [8, 32], strides = [1, 1]} : vector<8x64xf32> to vector<8x32xf32>
    %146 = vector.extract_strided_slice %137 {offsets = [0, 64], sizes = [8, 32], strides = [1, 1]} : vector<8x128xf32> to vector<8x32xf32>
    %147 = vector.extract_strided_slice %137 {offsets = [0, 96], sizes = [8, 32], strides = [1, 1]} : vector<8x128xf32> to vector<8x32xf32>
    %148 = arith.mulf %144, %147 : vector<8x32xf32>
    %149 = arith.addf %146, %148 : vector<8x32xf32>
    %150 = math.tanh %149 : vector<8x32xf32>
    %151 = arith.subf %112, %150 : vector<8x32xf32>
    %152 = arith.mulf %145, %151 : vector<8x32xf32>
    %153 = arith.addf %150, %152 : vector<8x32xf32>
    %154 = tpu.concatenate %153, %133 in 1 : vector<8x32xf32>, vector<8x32xf32> -> vector<8x64xf32>
    %155 = arith.truncf %154 : vector<8x64xf32> to vector<8x64xbf16>
    %cst_27 = arith.constant dense<0.000000e+00> : vector<8x128xf32>
    %156 = tpu.matmul %155, %7, %cst_27 {dimension_numbers = #tpu.dot_dimension_numbers<[1], [0], [0], [1], [0, 0, 1, 1], [], []>} : vector<8x64xbf16>, vector<64x128xbf16>, vector<8x128xf32> -> vector<8x128xf32>
    %157 = vector.broadcast %8 : vector<1x128xf32> to vector<8x128xf32>
    %158 = arith.addf %156, %157 : vector<8x128xf32>
    %159 = vector.extract_strided_slice %158 {offsets = [0, 0], sizes = [8, 64], strides = [1, 1]} : vector<8x128xf32> to vector<8x64xf32>
    %160 = arith.negf %159 : vector<8x64xf32>
    %161 = math.exp %160 : vector<8x64xf32>
    %cst_28 = arith.constant 1.000000e+00 : f32
    %162 = vector.broadcast %cst_28 : f32 to vector<8x64xf32>
    %163 = arith.addf %162, %161 : vector<8x64xf32>
    %164 = arith.divf %162, %163 : vector<8x64xf32>
    %165 = vector.extract_strided_slice %164 {offsets = [0, 0], sizes = [8, 32], strides = [1, 1]} : vector<8x64xf32> to vector<8x32xf32>
    %166 = vector.extract_strided_slice %164 {offsets = [0, 32], sizes = [8, 32], strides = [1, 1]} : vector<8x64xf32> to vector<8x32xf32>
    %167 = vector.extract_strided_slice %158 {offsets = [0, 64], sizes = [8, 32], strides = [1, 1]} : vector<8x128xf32> to vector<8x32xf32>
    %168 = vector.extract_strided_slice %158 {offsets = [0, 96], sizes = [8, 32], strides = [1, 1]} : vector<8x128xf32> to vector<8x32xf32>
    %169 = arith.mulf %165, %168 : vector<8x32xf32>
    %170 = arith.addf %167, %169 : vector<8x32xf32>
    %171 = math.tanh %170 : vector<8x32xf32>
    %172 = arith.subf %133, %171 : vector<8x32xf32>
    %173 = arith.mulf %166, %172 : vector<8x32xf32>
    %174 = arith.addf %171, %173 : vector<8x32xf32>
    %175 = vector.extract_strided_slice %5 {offsets = [32, 0], sizes = [8, 128], strides = [1, 1]} : vector<64x128xf32> to vector<8x128xf32>
    %176 = arith.truncf %153 : vector<8x32xf32> to vector<8x32xbf16>
    %cst_29 = arith.constant dense<0.000000e+00> : vector<8x128xf32>
    %177 = tpu.matmul %176, %6, %cst_29 {dimension_numbers = #tpu.dot_dimension_numbers<[1], [0], [0], [1], [0, 0, 1, 1], [], []>} : vector<8x32xbf16>, vector<32x128xbf16>, vector<8x128xf32> -> vector<8x128xf32>
    %178 = arith.addf %175, %177 : vector<8x128xf32>
    %179 = vector.extract_strided_slice %178 {offsets = [0, 0], sizes = [8, 64], strides = [1, 1]} : vector<8x128xf32> to vector<8x64xf32>
    %180 = arith.negf %179 : vector<8x64xf32>
    %181 = math.exp %180 : vector<8x64xf32>
    %cst_30 = arith.constant 1.000000e+00 : f32
    %182 = vector.broadcast %cst_30 : f32 to vector<8x64xf32>
    %183 = arith.addf %182, %181 : vector<8x64xf32>
    %184 = arith.divf %182, %183 : vector<8x64xf32>
    %185 = vector.extract_strided_slice %184 {offsets = [0, 0], sizes = [8, 32], strides = [1, 1]} : vector<8x64xf32> to vector<8x32xf32>
    %186 = vector.extract_strided_slice %184 {offsets = [0, 32], sizes = [8, 32], strides = [1, 1]} : vector<8x64xf32> to vector<8x32xf32>
    %187 = vector.extract_strided_slice %178 {offsets = [0, 64], sizes = [8, 32], strides = [1, 1]} : vector<8x128xf32> to vector<8x32xf32>
    %188 = vector.extract_strided_slice %178 {offsets = [0, 96], sizes = [8, 32], strides = [1, 1]} : vector<8x128xf32> to vector<8x32xf32>
    %189 = arith.mulf %185, %188 : vector<8x32xf32>
    %190 = arith.addf %187, %189 : vector<8x32xf32>
    %191 = math.tanh %190 : vector<8x32xf32>
    %192 = arith.subf %153, %191 : vector<8x32xf32>
    %193 = arith.mulf %186, %192 : vector<8x32xf32>
    %194 = arith.addf %191, %193 : vector<8x32xf32>
    %195 = tpu.concatenate %194, %174 in 1 : vector<8x32xf32>, vector<8x32xf32> -> vector<8x64xf32>
    %196 = arith.truncf %195 : vector<8x64xf32> to vector<8x64xbf16>
    %cst_31 = arith.constant dense<0.000000e+00> : vector<8x128xf32>
    %197 = tpu.matmul %196, %7, %cst_31 {dimension_numbers = #tpu.dot_dimension_numbers<[1], [0], [0], [1], [0, 0, 1, 1], [], []>} : vector<8x64xbf16>, vector<64x128xbf16>, vector<8x128xf32> -> vector<8x128xf32>
    %198 = vector.broadcast %8 : vector<1x128xf32> to vector<8x128xf32>
    %199 = arith.addf %197, %198 : vector<8x128xf32>
    %200 = vector.extract_strided_slice %199 {offsets = [0, 0], sizes = [8, 64], strides = [1, 1]} : vector<8x128xf32> to vector<8x64xf32>
    %201 = arith.negf %200 : vector<8x64xf32>
    %202 = math.exp %201 : vector<8x64xf32>
    %cst_32 = arith.constant 1.000000e+00 : f32
    %203 = vector.broadcast %cst_32 : f32 to vector<8x64xf32>
    %204 = arith.addf %203, %202 : vector<8x64xf32>
    %205 = arith.divf %203, %204 : vector<8x64xf32>
    %206 = vector.extract_strided_slice %205 {offsets = [0, 0], sizes = [8, 32], strides = [1, 1]} : vector<8x64xf32> to vector<8x32xf32>
    %207 = vector.extract_strided_slice %205 {offsets = [0, 32], sizes = [8, 32], strides = [1, 1]} : vector<8x64xf32> to vector<8x32xf32>
    %208 = vector.extract_strided_slice %199 {offsets = [0, 64], sizes = [8, 32], strides = [1, 1]} : vector<8x128xf32> to vector<8x32xf32>
    %209 = vector.extract_strided_slice %199 {offsets = [0, 96], sizes = [8, 32], strides = [1, 1]} : vector<8x128xf32> to vector<8x32xf32>
    %210 = arith.mulf %206, %209 : vector<8x32xf32>
    %211 = arith.addf %208, %210 : vector<8x32xf32>
    %212 = math.tanh %211 : vector<8x32xf32>
    %213 = arith.subf %174, %212 : vector<8x32xf32>
    %214 = arith.mulf %207, %213 : vector<8x32xf32>
    %215 = arith.addf %212, %214 : vector<8x32xf32>
    %216 = vector.extract_strided_slice %5 {offsets = [40, 0], sizes = [8, 128], strides = [1, 1]} : vector<64x128xf32> to vector<8x128xf32>
    %217 = arith.truncf %194 : vector<8x32xf32> to vector<8x32xbf16>
    %cst_33 = arith.constant dense<0.000000e+00> : vector<8x128xf32>
    %218 = tpu.matmul %217, %6, %cst_33 {dimension_numbers = #tpu.dot_dimension_numbers<[1], [0], [0], [1], [0, 0, 1, 1], [], []>} : vector<8x32xbf16>, vector<32x128xbf16>, vector<8x128xf32> -> vector<8x128xf32>
    %219 = arith.addf %216, %218 : vector<8x128xf32>
    %220 = vector.extract_strided_slice %219 {offsets = [0, 0], sizes = [8, 64], strides = [1, 1]} : vector<8x128xf32> to vector<8x64xf32>
    %221 = arith.negf %220 : vector<8x64xf32>
    %222 = math.exp %221 : vector<8x64xf32>
    %cst_34 = arith.constant 1.000000e+00 : f32
    %223 = vector.broadcast %cst_34 : f32 to vector<8x64xf32>
    %224 = arith.addf %223, %222 : vector<8x64xf32>
    %225 = arith.divf %223, %224 : vector<8x64xf32>
    %226 = vector.extract_strided_slice %225 {offsets = [0, 0], sizes = [8, 32], strides = [1, 1]} : vector<8x64xf32> to vector<8x32xf32>
    %227 = vector.extract_strided_slice %225 {offsets = [0, 32], sizes = [8, 32], strides = [1, 1]} : vector<8x64xf32> to vector<8x32xf32>
    %228 = vector.extract_strided_slice %219 {offsets = [0, 64], sizes = [8, 32], strides = [1, 1]} : vector<8x128xf32> to vector<8x32xf32>
    %229 = vector.extract_strided_slice %219 {offsets = [0, 96], sizes = [8, 32], strides = [1, 1]} : vector<8x128xf32> to vector<8x32xf32>
    %230 = arith.mulf %226, %229 : vector<8x32xf32>
    %231 = arith.addf %228, %230 : vector<8x32xf32>
    %232 = math.tanh %231 : vector<8x32xf32>
    %233 = arith.subf %194, %232 : vector<8x32xf32>
    %234 = arith.mulf %227, %233 : vector<8x32xf32>
    %235 = arith.addf %232, %234 : vector<8x32xf32>
    %236 = tpu.concatenate %235, %215 in 1 : vector<8x32xf32>, vector<8x32xf32> -> vector<8x64xf32>
    %237 = arith.truncf %236 : vector<8x64xf32> to vector<8x64xbf16>
    %cst_35 = arith.constant dense<0.000000e+00> : vector<8x128xf32>
    %238 = tpu.matmul %237, %7, %cst_35 {dimension_numbers = #tpu.dot_dimension_numbers<[1], [0], [0], [1], [0, 0, 1, 1], [], []>} : vector<8x64xbf16>, vector<64x128xbf16>, vector<8x128xf32> -> vector<8x128xf32>
    %239 = vector.broadcast %8 : vector<1x128xf32> to vector<8x128xf32>
    %240 = arith.addf %238, %239 : vector<8x128xf32>
    %241 = vector.extract_strided_slice %240 {offsets = [0, 0], sizes = [8, 64], strides = [1, 1]} : vector<8x128xf32> to vector<8x64xf32>
    %242 = arith.negf %241 : vector<8x64xf32>
    %243 = math.exp %242 : vector<8x64xf32>
    %cst_36 = arith.constant 1.000000e+00 : f32
    %244 = vector.broadcast %cst_36 : f32 to vector<8x64xf32>
    %245 = arith.addf %244, %243 : vector<8x64xf32>
    %246 = arith.divf %244, %245 : vector<8x64xf32>
    %247 = vector.extract_strided_slice %246 {offsets = [0, 0], sizes = [8, 32], strides = [1, 1]} : vector<8x64xf32> to vector<8x32xf32>
    %248 = vector.extract_strided_slice %246 {offsets = [0, 32], sizes = [8, 32], strides = [1, 1]} : vector<8x64xf32> to vector<8x32xf32>
    %249 = vector.extract_strided_slice %240 {offsets = [0, 64], sizes = [8, 32], strides = [1, 1]} : vector<8x128xf32> to vector<8x32xf32>
    %250 = vector.extract_strided_slice %240 {offsets = [0, 96], sizes = [8, 32], strides = [1, 1]} : vector<8x128xf32> to vector<8x32xf32>
    %251 = arith.mulf %247, %250 : vector<8x32xf32>
    %252 = arith.addf %249, %251 : vector<8x32xf32>
    %253 = math.tanh %252 : vector<8x32xf32>
    %254 = arith.subf %215, %253 : vector<8x32xf32>
    %255 = arith.mulf %248, %254 : vector<8x32xf32>
    %256 = arith.addf %253, %255 : vector<8x32xf32>
    %257 = vector.extract_strided_slice %5 {offsets = [48, 0], sizes = [8, 128], strides = [1, 1]} : vector<64x128xf32> to vector<8x128xf32>
    %258 = arith.truncf %235 : vector<8x32xf32> to vector<8x32xbf16>
    %cst_37 = arith.constant dense<0.000000e+00> : vector<8x128xf32>
    %259 = tpu.matmul %258, %6, %cst_37 {dimension_numbers = #tpu.dot_dimension_numbers<[1], [0], [0], [1], [0, 0, 1, 1], [], []>} : vector<8x32xbf16>, vector<32x128xbf16>, vector<8x128xf32> -> vector<8x128xf32>
    %260 = arith.addf %257, %259 : vector<8x128xf32>
    %261 = vector.extract_strided_slice %260 {offsets = [0, 0], sizes = [8, 64], strides = [1, 1]} : vector<8x128xf32> to vector<8x64xf32>
    %262 = arith.negf %261 : vector<8x64xf32>
    %263 = math.exp %262 : vector<8x64xf32>
    %cst_38 = arith.constant 1.000000e+00 : f32
    %264 = vector.broadcast %cst_38 : f32 to vector<8x64xf32>
    %265 = arith.addf %264, %263 : vector<8x64xf32>
    %266 = arith.divf %264, %265 : vector<8x64xf32>
    %267 = vector.extract_strided_slice %266 {offsets = [0, 0], sizes = [8, 32], strides = [1, 1]} : vector<8x64xf32> to vector<8x32xf32>
    %268 = vector.extract_strided_slice %266 {offsets = [0, 32], sizes = [8, 32], strides = [1, 1]} : vector<8x64xf32> to vector<8x32xf32>
    %269 = vector.extract_strided_slice %260 {offsets = [0, 64], sizes = [8, 32], strides = [1, 1]} : vector<8x128xf32> to vector<8x32xf32>
    %270 = vector.extract_strided_slice %260 {offsets = [0, 96], sizes = [8, 32], strides = [1, 1]} : vector<8x128xf32> to vector<8x32xf32>
    %271 = arith.mulf %267, %270 : vector<8x32xf32>
    %272 = arith.addf %269, %271 : vector<8x32xf32>
    %273 = math.tanh %272 : vector<8x32xf32>
    %274 = arith.subf %235, %273 : vector<8x32xf32>
    %275 = arith.mulf %268, %274 : vector<8x32xf32>
    %276 = arith.addf %273, %275 : vector<8x32xf32>
    %277 = tpu.concatenate %276, %256 in 1 : vector<8x32xf32>, vector<8x32xf32> -> vector<8x64xf32>
    %278 = arith.truncf %277 : vector<8x64xf32> to vector<8x64xbf16>
    %cst_39 = arith.constant dense<0.000000e+00> : vector<8x128xf32>
    %279 = tpu.matmul %278, %7, %cst_39 {dimension_numbers = #tpu.dot_dimension_numbers<[1], [0], [0], [1], [0, 0, 1, 1], [], []>} : vector<8x64xbf16>, vector<64x128xbf16>, vector<8x128xf32> -> vector<8x128xf32>
    %280 = vector.broadcast %8 : vector<1x128xf32> to vector<8x128xf32>
    %281 = arith.addf %279, %280 : vector<8x128xf32>
    %282 = vector.extract_strided_slice %281 {offsets = [0, 0], sizes = [8, 64], strides = [1, 1]} : vector<8x128xf32> to vector<8x64xf32>
    %283 = arith.negf %282 : vector<8x64xf32>
    %284 = math.exp %283 : vector<8x64xf32>
    %cst_40 = arith.constant 1.000000e+00 : f32
    %285 = vector.broadcast %cst_40 : f32 to vector<8x64xf32>
    %286 = arith.addf %285, %284 : vector<8x64xf32>
    %287 = arith.divf %285, %286 : vector<8x64xf32>
    %288 = vector.extract_strided_slice %287 {offsets = [0, 0], sizes = [8, 32], strides = [1, 1]} : vector<8x64xf32> to vector<8x32xf32>
    %289 = vector.extract_strided_slice %287 {offsets = [0, 32], sizes = [8, 32], strides = [1, 1]} : vector<8x64xf32> to vector<8x32xf32>
    %290 = vector.extract_strided_slice %281 {offsets = [0, 64], sizes = [8, 32], strides = [1, 1]} : vector<8x128xf32> to vector<8x32xf32>
    %291 = vector.extract_strided_slice %281 {offsets = [0, 96], sizes = [8, 32], strides = [1, 1]} : vector<8x128xf32> to vector<8x32xf32>
    %292 = arith.mulf %288, %291 : vector<8x32xf32>
    %293 = arith.addf %290, %292 : vector<8x32xf32>
    %294 = math.tanh %293 : vector<8x32xf32>
    %295 = arith.subf %256, %294 : vector<8x32xf32>
    %296 = arith.mulf %289, %295 : vector<8x32xf32>
    %297 = arith.addf %294, %296 : vector<8x32xf32>
    %298 = vector.extract_strided_slice %5 {offsets = [56, 0], sizes = [8, 128], strides = [1, 1]} : vector<64x128xf32> to vector<8x128xf32>
    %299 = arith.truncf %276 : vector<8x32xf32> to vector<8x32xbf16>
    %cst_41 = arith.constant dense<0.000000e+00> : vector<8x128xf32>
    %300 = tpu.matmul %299, %6, %cst_41 {dimension_numbers = #tpu.dot_dimension_numbers<[1], [0], [0], [1], [0, 0, 1, 1], [], []>} : vector<8x32xbf16>, vector<32x128xbf16>, vector<8x128xf32> -> vector<8x128xf32>
    %301 = arith.addf %298, %300 : vector<8x128xf32>
    %302 = vector.extract_strided_slice %301 {offsets = [0, 0], sizes = [8, 64], strides = [1, 1]} : vector<8x128xf32> to vector<8x64xf32>
    %303 = arith.negf %302 : vector<8x64xf32>
    %304 = math.exp %303 : vector<8x64xf32>
    %cst_42 = arith.constant 1.000000e+00 : f32
    %305 = vector.broadcast %cst_42 : f32 to vector<8x64xf32>
    %306 = arith.addf %305, %304 : vector<8x64xf32>
    %307 = arith.divf %305, %306 : vector<8x64xf32>
    %308 = vector.extract_strided_slice %307 {offsets = [0, 0], sizes = [8, 32], strides = [1, 1]} : vector<8x64xf32> to vector<8x32xf32>
    %309 = vector.extract_strided_slice %307 {offsets = [0, 32], sizes = [8, 32], strides = [1, 1]} : vector<8x64xf32> to vector<8x32xf32>
    %310 = vector.extract_strided_slice %301 {offsets = [0, 64], sizes = [8, 32], strides = [1, 1]} : vector<8x128xf32> to vector<8x32xf32>
    %311 = vector.extract_strided_slice %301 {offsets = [0, 96], sizes = [8, 32], strides = [1, 1]} : vector<8x128xf32> to vector<8x32xf32>
    %312 = arith.mulf %308, %311 : vector<8x32xf32>
    %313 = arith.addf %310, %312 : vector<8x32xf32>
    %314 = math.tanh %313 : vector<8x32xf32>
    %315 = arith.subf %276, %314 : vector<8x32xf32>
    %316 = arith.mulf %309, %315 : vector<8x32xf32>
    %317 = arith.addf %314, %316 : vector<8x32xf32>
    %318 = tpu.concatenate %317, %297 in 1 : vector<8x32xf32>, vector<8x32xf32> -> vector<8x64xf32>
    %319 = arith.truncf %318 : vector<8x64xf32> to vector<8x64xbf16>
    %cst_43 = arith.constant dense<0.000000e+00> : vector<8x128xf32>
    %320 = tpu.matmul %319, %7, %cst_43 {dimension_numbers = #tpu.dot_dimension_numbers<[1], [0], [0], [1], [0, 0, 1, 1], [], []>} : vector<8x64xbf16>, vector<64x128xbf16>, vector<8x128xf32> -> vector<8x128xf32>
    %321 = vector.broadcast %8 : vector<1x128xf32> to vector<8x128xf32>
    %322 = arith.addf %320, %321 : vector<8x128xf32>
    %323 = vector.extract_strided_slice %322 {offsets = [0, 0], sizes = [8, 64], strides = [1, 1]} : vector<8x128xf32> to vector<8x64xf32>
    %324 = arith.negf %323 : vector<8x64xf32>
    %325 = math.exp %324 : vector<8x64xf32>
    %cst_44 = arith.constant 1.000000e+00 : f32
    %326 = vector.broadcast %cst_44 : f32 to vector<8x64xf32>
    %327 = arith.addf %326, %325 : vector<8x64xf32>
    %328 = arith.divf %326, %327 : vector<8x64xf32>
    %329 = vector.extract_strided_slice %328 {offsets = [0, 0], sizes = [8, 32], strides = [1, 1]} : vector<8x64xf32> to vector<8x32xf32>
    %330 = vector.extract_strided_slice %328 {offsets = [0, 32], sizes = [8, 32], strides = [1, 1]} : vector<8x64xf32> to vector<8x32xf32>
    %331 = vector.extract_strided_slice %322 {offsets = [0, 64], sizes = [8, 32], strides = [1, 1]} : vector<8x128xf32> to vector<8x32xf32>
    %332 = vector.extract_strided_slice %322 {offsets = [0, 96], sizes = [8, 32], strides = [1, 1]} : vector<8x128xf32> to vector<8x32xf32>
    %333 = arith.mulf %329, %332 : vector<8x32xf32>
    %334 = arith.addf %331, %333 : vector<8x32xf32>
    %335 = math.tanh %334 : vector<8x32xf32>
    %336 = arith.subf %297, %335 : vector<8x32xf32>
    %337 = arith.mulf %330, %336 : vector<8x32xf32>
    %338 = arith.addf %335, %337 : vector<8x32xf32>
    %339 = arith.truncf %338 : vector<8x32xf32> to vector<8x32xbf16>
    %c0_45 = arith.constant 0 : index
    %c0_46 = arith.constant 0 : index
    %340 = vector.load %arg6[%c0_45, %c0_46] : memref<32x128xbf16, #tpu.memory_space<vmem>>, vector<32x128xbf16>
    %cst_47 = arith.constant dense<0.000000e+00> : vector<8x128xf32>
    %341 = tpu.matmul %339, %340, %cst_47 {dimension_numbers = #tpu.dot_dimension_numbers<[1], [0], [0], [1], [0, 0, 1, 1], [], []>} : vector<8x32xbf16>, vector<32x128xbf16>, vector<8x128xf32> -> vector<8x128xf32>
    %c0_48 = arith.constant 0 : index
    %c0_49 = arith.constant 0 : index
    %342 = vector.load %arg7[%c0_48, %c0_49] : memref<1x128xf32, #tpu.memory_space<vmem>>, vector<1x128xf32>
    %343 = vector.broadcast %342 : vector<1x128xf32> to vector<8x128xf32>
    %344 = arith.addf %341, %343 : vector<8x128xf32>
    %c0_50 = arith.constant 0 : index
    %c0_51 = arith.constant 0 : index
    %345 = vector.load %arg8[%c0_50, %c0_51] : memref<8x128xf32, #tpu.memory_space<vmem>>, vector<8x128xf32>
    tpu.vector_store %arg8[%c0_50, %c0_51], %344 {strides = array<i32>} : memref<8x128xf32, #tpu.memory_space<vmem>>, vector<8x128xf32>,
    return
  }
}

</mosaic_0001>

<bundles_post_ra>
// kernel: gru_model_forward.1
= control target key start
LH: loop header
LB: loop body
LE: loop exit
PB: predicated region body
PF: predicated region fallthrough
CT: control target
= control target key end

     0   :  { %vm79_vm0 = vcmask 1043456   ;;  %vm66_vm1 = vcmask 64512   ;;  %v1947_v1 = vmov 0.0   ;;  %vm1948_vm2 = vmmov 0   ;;  %s1950_s15 = smov 32   ;;  %s1951_s16 = smov 64   ;;  %s2421_s1 = inlined_call_operand.vmem [shape: bf16[8,128], index: 1, kind: input, shape index: {}]   ;;  %s2422_s2 = inlined_call_operand.vmem [shape: bf16[32,128], index: 2, kind: input, shape index: {}]   ;;  %s2423_s0 = inlined_call_operand.vmem [shape: bf16[64,8], index: 0, kind: input, shape index: {}]   ;;  %s2424_s3 = inlined_call_operand.vmem [shape: f32[1,128], index: 3, kind: input, shape index: {}]   ;;  %s2425_s4 = inlined_call_operand.vmem [shape: bf16[64,128], index: 4, kind: input, shape index: {}]   ;;  %s2426_s5 = inlined_call_operand.vmem [shape: f32[1,128], index: 5, kind: input, shape index: {}]   ;;  %s2427_s6 = inlined_call_operand.vmem [shape: bf16[32,128], index: 6, kind: input, shape index: {}]   ;;  %s2428_s7 = inlined_call_operand.vmem [shape: f32[1,128], index: 7, kind: input, shape index: {}]   ;;  %s2429_s8 = inlined_call_operand.vmem [shape: f32[8,128], index: 8, kind: output, shape index: {}]  }
   0x1   :  { %v38_v0 = vld [vmem:[%s2421_s1] sm:$0xf]  ;;  %1661 = vmatprep.subr.bf16.mxu1 %v1947_v1  ;;  %1665 = vmatprep.mubr.msk.bf16.mxu1 %vm1948_vm2, %v1947_v1  ;;  %v1838_v5 = vld [vmem:[%s2423_s0 + $0x8] sm:$0xff]   ;;  %v1949_v7 = vmov 0   ;;  %s1952_s17 = smov 96   ;;  %v1842_v29 = vld [vmem:[%s2423_s0 + $0x10] sm:$0xff]  }
   0x2   :  { %1829 = vmatprep.subr.msk.bf16.mxu0 %vm79_vm0, %v38_v0  ;;  %v81_v2 = vsel %vm79_vm0, %v38_v0, 0  ;;  %v2007_v3 = vld [vmem:[%s2422_s2] sm:$0xff]   ;;  %v2022_v6 = vld [vmem:[%s2422_s2 + $0x8] sm:$0xff]   ;;  %v1843_v30 = vld [vmem:[%s2423_s0 + $0x18] sm:$0xff]   ;;  %vm173_vm3 = vcmask 261120   ;;  %vm282_vm4 = vcmask 523264  }
   0x3   :  { %1652 = vmatpush3.bf16.msra.mxu0 %v81_v2  ;;  %v1837_v4 = vld [vmem:[%s2423_s0] sm:$0xff]   ;;  %1662 = vmatpush3.bf16.msra.mxu1 %v2007_v3  ;;  %v2064_v32 = vld [vmem:[%s2425_s4 + $0x8] sm:$0xff]   ;;  %v2074_v35 = vld [vmem:[%s2425_s4 + $0x10] sm:$0xff]  }
   0x4   :  { %1669 = vmatprep.subr.bf16.mxu0 %v1947_v1  ;;  %1653 = vmatprep.mubr.msk.bf16.mxu0 %vm66_vm1, %v1837_v4  ;;  %v2036_v8 = vld [vmem:[%s2424_s3] ss:$0 sm:$0xff]  ;;  %v2083_v36 = vld [vmem:[%s2425_s4 + $0x18] sm:$0xff]  }
   0x5   :  { %1663 = vmatprep.subr.bf16.mxu1 %v1947_v1  ;;  %v2057_v31 = vld [vmem:[%s2425_s4] sm:$0xff]  }
   0x6   :  { %1654 = vmatmul.mubr.msk.bf16.vlgmr.msra.gmra.mrb[0].mxu0 %vm66_vm1, %v1838_v5  ;;  %v2126_v49 = vld [vmem:[%s2426_s5] ss:$0 sm:$0xff] }
   0x7   :  { %1664 = vmatpush3.bf16.msra.mxu1 %v2022_v6  ;;  %1657 = vmatprep.mubr.msk.bf16.mxu0 %vm66_vm1, %v1842_v29 }
   0x8   :  { %1681 = vmatprep.subr.bf16.mxu1 %v1947_v1  ;;  %1670 = vmatpush3.bf16.msra.mxu0 %v2057_v31 }
   0x9   :  { %1671 = vmatprep.subr.bf16.mxu0 %v1947_v1 }
   0xa   :  { %1666 = vmatmul.mubr.bf16.vlgmr.msra.gmra.mrb[0].mxu1 %v1949_v7 }
   0xb   :  { %1682 = vmatpush3.bf16.msra.mxu1 %v2007_v3  ;;  %1685 = vmatprep.mubr.msk.bf16.mxu1 %vm1948_vm2, %v1947_v1 }
   0xc   :  { %1683 = vmatprep.subr.bf16.mxu1 %v1947_v1  ;;  %1672 = vmatpush3.bf16.msra.mxu0 %v2064_v32 }
   0xd   :  { %1673 = vmatprep.subr.bf16.mxu0 %v1947_v1 }
   0xe   :  { %1658 = vmatmul.mubr.msk.bf16.gmra.mrb[4].mxu0 %vm66_vm1, %v1843_v30 }
   0xf   :  { %1684 = vmatpush3.bf16.msra.mxu1 %v2022_v6  ;;  %1677 = vmatprep.mubr.msk.bf16.mxu0 %vm1948_vm2, %v1947_v1 }
  0x10   :  { %1689 = vmatprep.subr.bf16.mxu1 %v1947_v1  ;;  %1674 = vmatpush3.bf16.msra.mxu0 %v2074_v35 }
  0x11   :  { %1675 = vmatprep.subr.bf16.mxu0 %v1947_v1 }
  0x14   :  { %1676 = vmatpush3.bf16.msra.mxu0 %v2083_v36 }
  0x15   :  { %1701 = vmatprep.subr.bf16.mxu0 %v1947_v1 }
  0xd9   :  { %v2038_v9 = vpop.f32.mrb[0].mxu0 }
  0xda   :  { %v117_v10 = vpop.f32.mrb[1].mxu0 }
  0xdb   :  { %v118_v11 = vadd.f32 %v2036_v8, %v117_v10  ;;  %v2041_v12 = vpop.f32.mrb[2].mxu0 }
  0xdc   :  { %v2043_v13 = vpop.f32.mrb[3].mxu0 }
  0xdd   :  { %v211_v14 = vpop.f32.mrb[0].mxu1  ;;  %v121_v48 = vadd.f32 %v2036_v8, %v2043_v13 }
  0xde   :  { %v217_v15 = vadd.f32 %v211_v14, %v118_v11  ;;  %v1667_v16 = vpop.f32.mrb[1].mxu1 }
  0xdf   :  { %v214_v17 = vpop.f32.mrb[2].mxu1 }
  0xe0   :  { %v1668_v18 = vpop.f32.mrb[3].mxu1  ;;  %225 = vrot.lane.b32.xlu0 %v217_v15, %s1950_s15  ;;  %v1539_v19 = vmul.f32 -1.442695, %v217_v15 }
  0xe1   :  { %v2094_v40 = vpop.f32.mrb[4].mxu0 }
  0xe2   :  { %1848 = vpow2.f32 %v1539_v19  ;;  %v2096_v41 = vpop.f32.mrb[5].mxu0 }
  0xe3   :  { %v2098_v42 = vpop.f32.mrb[6].mxu0 }
  0xe4   :  { %v2100_v43 = vpop.f32.mrb[7].mxu0 }
  0xec   :  { %v1849_v20 = vpop.eup %1848 }
  0xed   :  { %v221_v21 = vadd.f32 1.0, %v1849_v20 }
  0xef   :  { %1850 = vrcp.f32 %v221_v21 }
  0xf9   :  { %v1851_v22 = vpop.eup %1850 }
 0x152   :  { %v226_v23 = vpop.permute.xlu0 %225 }
 0x153   :  { %v228_v24 = vmul.f32 %v1851_v22, %v226_v23 }
 0x155   :  { %230 = vrot.lane.b32.xlu0 %v228_v24, %s1951_s16 }
 0x1c7   :  { %v231_v25 = vpop.permute.xlu0 %230 }
 0x1c8   :  { %v233_v26 = vadd.f32 %v231_v25, %v217_v15 }
 0x1ca   :  { %1852 = vtanh.f32 %v233_v26 }
 0x1d4   :  { %v1853_v27 = vpop.eup %1852 }
 0x1d5   :  { %v235_v28 = vsub.f32 0.0, %v1853_v27 }
 0x1d7   :  { %237 = vrot.lane.b32.xlu1 %v235_v28, %s1952_s17 }
 0x249   :  { %v238_v33 = vpop.permute.xlu1 %237 }
 0x24a   :  { %v240_v34 = vmul.f32 %v1851_v22, %v238_v33 }
 0x24c   :  { %242 = vrot.lane.b32.xlu1 %v240_v34, %s1950_s15 }
 0x2be   :  { %v243_v37 = vpop.permute.xlu1 %242 }
 0x2bf   :  { %v2087_v38 = vadd.f32 %v1853_v27, %v243_v37 }
 0x2c1   :  { %247 = vrot.lane.b32.xlu0 %v2087_v38, %s1951_s16  ;;  %v354_v39 = vpack.c.bf16 %v2087_v38, %v2087_v38 }
 0x2c3   :  { %356 = vrot.lane.b32.xlu1 %v354_v39, %s1951_s16 }
 0x333   :  { %v248_v44 = vpop.permute.xlu0 %247 }
 0x334   :  { %v250_v45 = vsel %vm173_vm3, %v248_v44, 0.0  ;;  %v126_v44 = vadd.f32 %v2038_v9, %v2036_v8 }
 0x335   :  { %v251_v46 = vpack.c.bf16 %v250_v45, %v250_v45  ;;  %v357_v47 = vpop.permute.xlu1 %356 }
 0x336   :  { %1686 = vmatmul.mubr.msk.bf16.vlgmr.msra.gmra.mrb[4].mxu1 %vm173_vm3, %v357_v47 }
 0x337   :  { %1678 = vmatmul.mubr.msk.bf16.vlgmr.msra.gmra.mrb[8].mxu0 %vm282_vm4, %v251_v46  ;;  %1690 = vmatpush3.bf16.msra.mxu1 %v2057_v31 }
 0x338   :  { %1691 = vmatprep.subr.bf16.mxu1 %v1947_v1  ;;  %1702 = vmatpush3.bf16.msra.mxu0 %v2007_v3 }
 0x339   :  { %1703 = vmatprep.subr.bf16.mxu0 %v1947_v1  ;;  %1697 = vmatprep.mubr.msk.bf16.mxu1 %vm1948_vm2, %v1947_v1 }
 0x33a   :  { %1705 = vmatprep.mubr.msk.bf16.mxu0 %vm1948_vm2, %v1947_v1 }
 0x33b   :  { %1692 = vmatpush3.bf16.msra.mxu1 %v2064_v32 }
 0x33c   :  { %1693 = vmatprep.subr.bf16.mxu1 %v1947_v1  ;;  %1704 = vmatpush3.bf16.msra.mxu0 %v2022_v6 }
 0x33d   :  { %1709 = vmatprep.subr.bf16.mxu0 %v1947_v1 }
 0x33f   :  { %1694 = vmatpush3.bf16.msra.mxu1 %v2074_v35 }
 0x340   :  { %1695 = vmatprep.subr.bf16.mxu1 %v1947_v1 }
 0x343   :  { %1696 = vmatpush3.bf16.msra.mxu1 %v2083_v36 }
 0x344   :  { %1721 = vmatprep.subr.bf16.mxu1 %v1947_v1 }
 0x409   :  { %v395_v50 = vpop.f32.mrb[4].mxu1 }
 0x40a   :  { %v401_v51 = vadd.f32 %v395_v50, %v121_v48  ;;  %v320_v52 = vpop.f32.mrb[8].mxu0  ;;  %v1687_v53 = vpop.f32.mrb[5].mxu1 }
 0x40b   :  { %v321_v54 = vadd.f32 %v2126_v49, %v320_v52  ;;  %v1679_v55 = vpop.f32.mrb[9].mxu0  ;;  %v398_v56 = vpop.f32.mrb[6].mxu1 }
 0x40c   :  { %v323_v57 = vpop.f32.mrb[10].mxu0  ;;  %409 = vrot.lane.b32.xlu1 %v401_v51, %s1950_s15  ;;  %v1688_v58 = vpop.f32.mrb[7].mxu1  ;;  %v1548_v60 = vmul.f32 -1.442695, %v401_v51 }
 0x40d   :  { %333 = vrot.lane.b32.xlu0 %v321_v54, %s1950_s15  ;;  %v1680_v59 = vpop.f32.mrb[11].mxu0  ;;  %v1546_v61 = vmul.f32 -1.442695, %v321_v54 }
 0x40e   :  { %1854 = vpow2.f32 %v1548_v60 }
 0x40f   :  { %1856 = vpow2.f32 %v1546_v61 }
 0x418   :  { %v1855_v62 = vpop.eup %1854 }
 0x419   :  { %v1857_v63 = vpop.eup %1856  ;;  %v405_v0 = vadd.f32 1.0, %v1855_v62 }
 0x41a   :  { %v329_v2 = vadd.f32 1.0, %v1857_v63 }
 0x41b   :  { %1858 = vrcp.f32 %v405_v0 }
 0x41c   :  { %1860 = vrcp.f32 %v329_v2 }
 0x425   :  { %v1859_v4 = vpop.eup %1858 }
 0x426   :  { %v1861_v7 = vpop.eup %1860 }
 0x47e   :  { %v410_v5 = vpop.permute.xlu1 %409 }
 0x47f   :  { %v412_v10 = vmul.f32 %v1859_v4, %v410_v5  ;;  %v334_v11 = vpop.permute.xlu0 %333 }
 0x480   :  { %v336_v13 = vmul.f32 %v1861_v7, %v334_v11 }
 0x481   :  { %414 = vrot.lane.b32.xlu1 %v412_v10, %s1951_s16 }
 0x482   :  { %338 = vrot.lane.b32.xlu0 %v336_v13, %s1951_s16 }
 0x4f3   :  { %v415_v14 = vpop.permute.xlu1 %414 }
 0x4f4   :  { %v417_v15 = vadd.f32 %v415_v14, %v401_v51  ;;  %v339_v16 = vpop.permute.xlu0 %338 }
 0x4f5   :  { %v341_v17 = vadd.f32 %v339_v16, %v321_v54 }
 0x4f6   :  { %1862 = vtanh.f32 %v417_v15 }
 0x4f7   :  { %1864 = vtanh.f32 %v341_v17 }
 0x500   :  { %v1863_v18 = vpop.eup %1862 }
 0x501   :  { %v1865_v19 = vpop.eup %1864  ;;  %v419_v20 = vsub.f32 %v2087_v38, %v1863_v18 }
 0x502   :  { %v343_v21 = vsub.f32 0.0, %v1865_v19 }
 0x503   :  { %421 = vrot.lane.b32.xlu1 %v419_v20, %s1952_s17 }
 0x504   :  { %345 = vrot.lane.b32.xlu0 %v343_v21, %s1952_s17 }
 0x575   :  { %v422_v22 = vpop.permute.xlu1 %421 }
 0x576   :  { %v424_v23 = vmul.f32 %v1859_v4, %v422_v22  ;;  %v346_v24 = vpop.permute.xlu0 %345 }
 0x577   :  { %v348_v25 = vmul.f32 %v1861_v7, %v346_v24 }
 0x578   :  { %426 = vrot.lane.b32.xlu1 %v424_v23, %s1950_s15 }
 0x579   :  { %350 = vrot.lane.b32.xlu0 %v348_v25, %s1950_s15 }
 0x5ea   :  { %v427_v26 = vpop.permute.xlu1 %426 }
 0x5eb   :  { %v2138_v27 = vadd.f32 %v1863_v18, %v427_v26  ;;  %v351_v28 = vpop.permute.xlu0 %350 }
 0x5ec   :  { %v2140_v29 = vadd.f32 %v1865_v19, %v351_v28 }
 0x5ed   :  { %431 = vrot.lane.b32.xlu0 %v2138_v27, %s1951_s16  ;;  %v511_v30 = vpack.c.bf16 %v2138_v27, %v2138_v27 }
 0x5ee   :  { %435 = vrot.lane.b32.xlu1 %v2140_v29, %s1952_s17 }
 0x5f1   :  { %513 = vrot.lane.b32.xlu0 %v511_v30, %s1951_s16 }
 0x65f   :  { %v432_v33 = vpop.permute.xlu0 %431 }
 0x660   :  { %v436_v34 = vpop.permute.xlu1 %435 }
 0x661   :  { %v438_v37 = vsel %vm173_vm3, %v432_v33, %v436_v34  ;;  %v129_v33 = vadd.f32 %v2041_v12, %v2036_v8 }
 0x662   :  { %v439_v38 = vpack.c.bf16 %v438_v37, %v438_v37 }
 0x663   :  { %v514_v39 = vpop.permute.xlu0 %513 }
 0x664   :  { %1698 = vmatmul.mubr.msk.bf16.vlgmr.msra.gmra.mrb[8].mxu1 %vm282_vm4, %v439_v38  ;;  %1706 = vmatmul.mubr.msk.bf16.vlgmr.msra.gmra.mrb[12].mxu0 %vm173_vm3, %v514_v39 }
 0x665   :  { %1710 = vmatpush3.bf16.msra.mxu0 %v2057_v31  ;;  %1722 = vmatpush3.bf16.msra.mxu1 %v2007_v3 }
 0x666   :  { %1711 = vmatprep.subr.bf16.mxu0 %v1947_v1  ;;  %1723 = vmatprep.subr.bf16.mxu1 %v1947_v1 }
 0x667   :  { %1717 = vmatprep.mubr.msk.bf16.mxu0 %vm1948_vm2, %v1947_v1  ;;  %1725 = vmatprep.mubr.msk.bf16.mxu1 %vm1948_vm2, %v1947_v1 }
 0x669   :  { %1712 = vmatpush3.bf16.msra.mxu0 %v2064_v32  ;;  %1724 = vmatpush3.bf16.msra.mxu1 %v2022_v6 }
 0x66a   :  { %1713 = vmatprep.subr.bf16.mxu0 %v1947_v1  ;;  %1729 = vmatprep.subr.bf16.mxu1 %v1947_v1 }
 0x66d   :  { %1714 = vmatpush3.bf16.msra.mxu0 %v2074_v35 }
 0x66e   :  { %1715 = vmatprep.subr.bf16.mxu0 %v1947_v1 }
 0x671   :  { %1716 = vmatpush3.bf16.msra.mxu0 %v2083_v36 }
 0x672   :  { %1741 = vmatprep.subr.bf16.mxu0 %v1947_v1 }
 0x737   :  { %v477_v45 = vpop.f32.mrb[8].mxu1  ;;  %v552_v46 = vpop.f32.mrb[12].mxu0 }
 0x738   :  { %v478_v47 = vadd.f32 %v2126_v49, %v477_v45  ;;  %v558_v48 = vadd.f32 %v552_v46, %v126_v44  ;;  %v1699_v50 = vpop.f32.mrb[9].mxu1  ;;  %v1707_v51 = vpop.f32.mrb[13].mxu0 }
 0x739   :  { %v480_v52 = vpop.f32.mrb[10].mxu1  ;;  %v555_v53 = vpop.f32.mrb[14].mxu0 }
 0x73a   :  { %566 = vrot.lane.b32.xlu0 %v558_v48, %s1950_s15  ;;  %v1708_v54 = vpop.f32.mrb[15].mxu0  ;;  %490 = vrot.lane.b32.xlu1 %v478_v47, %s1950_s15  ;;  %v1700_v55 = vpop.f32.mrb[11].mxu1  ;;  %v1550_v56 = vmul.f32 -1.442695, %v478_v47  ;;  %v1552_v57 = vmul.f32 -1.442695, %v558_v48 }
 0x73c   :  { %1866 = vpow2.f32 %v1550_v56 }
 0x73d   :  { %1868 = vpow2.f32 %v1552_v57 }
 0x746   :  { %v1867_v9 = vpop.eup %1866 }
 0x747   :  { %v1869_v58 = vpop.eup %1868  ;;  %v486_v59 = vadd.f32 1.0, %v1867_v9 }
 0x748   :  { %v562_v60 = vadd.f32 1.0, %v1869_v58 }
 0x749   :  { %1870 = vrcp.f32 %v486_v59 }
 0x74a   :  { %1872 = vrcp.f32 %v562_v60 }
 0x753   :  { %v1871_v61 = vpop.eup %1870 }
 0x754   :  { %v1873_v62 = vpop.eup %1872 }
 0x7ac   :  { %v567_v63 = vpop.permute.xlu0 %566  ;;  %v491_v0 = vpop.permute.xlu1 %490 }
 0x7ad   :  { %v569_v2 = vmul.f32 %v1873_v62, %v567_v63  ;;  %v493_v4 = vmul.f32 %v1871_v61, %v491_v0 }
 0x7af   :  { %571 = vrot.lane.b32.xlu0 %v569_v2, %s1951_s16  ;;  %495 = vrot.lane.b32.xlu1 %v493_v4, %s1951_s16 }
 0x821   :  { %v572_v5 = vpop.permute.xlu0 %571  ;;  %v496_v7 = vpop.permute.xlu1 %495 }
 0x822   :  { %v574_v10 = vadd.f32 %v572_v5, %v558_v48  ;;  %v498_v11 = vadd.f32 %v496_v7, %v478_v47 }
 0x824   :  { %1874 = vtanh.f32 %v574_v10 }
 0x825   :  { %1876 = vtanh.f32 %v498_v11 }
 0x82e   :  { %v1875_v13 = vpop.eup %1874 }
 0x82f   :  { %v1877_v14 = vpop.eup %1876  ;;  %v576_v15 = vsub.f32 %v2138_v27, %v1875_v13 }
 0x830   :  { %v500_v16 = vsub.f32 %v2140_v29, %v1877_v14 }
 0x831   :  { %578 = vrot.lane.b32.xlu0 %v576_v15, %s1952_s17 }
 0x832   :  { %502 = vrot.lane.b32.xlu1 %v500_v16, %s1952_s17 }
 0x8a3   :  { %v579_v17 = vpop.permute.xlu0 %578 }
 0x8a4   :  { %v581_v18 = vmul.f32 %v1873_v62, %v579_v17  ;;  %v503_v19 = vpop.permute.xlu1 %502 }
 0x8a5   :  { %v505_v20 = vmul.f32 %v1871_v61, %v503_v19 }
 0x8a6   :  { %583 = vrot.lane.b32.xlu0 %v581_v18, %s1950_s15 }
 0x8a7   :  { %507 = vrot.lane.b32.xlu1 %v505_v20, %s1950_s15 }
 0x918   :  { %v584_v21 = vpop.permute.xlu0 %583 }
 0x919   :  { %v2181_v22 = vadd.f32 %v1875_v13, %v584_v21  ;;  %v508_v23 = vpop.permute.xlu1 %507 }
 0x91a   :  { %v2183_v24 = vadd.f32 %v1877_v14, %v508_v23 }
 0x91b   :  { %588 = vrot.lane.b32.xlu1 %v2181_v22, %s1951_s16  ;;  %v668_v25 = vpack.c.bf16 %v2181_v22, %v2181_v22 }
 0x91c   :  { %592 = vrot.lane.b32.xlu0 %v2183_v24, %s1952_s17 }
 0x91f   :  { %670 = vrot.lane.b32.xlu1 %v668_v25, %s1951_s16  ;;  %v134_v25 = vadd.f32 %v2036_v8, %v2096_v41 }
 0x98d   :  { %v589_v26 = vpop.permute.xlu1 %588 }
 0x98e   :  { %v593_v27 = vpop.permute.xlu0 %592 }
 0x98f   :  { %v595_v28 = vsel %vm173_vm3, %v589_v26, %v593_v27 }
 0x990   :  { %v596_v29 = vpack.c.bf16 %v595_v28, %v595_v28 }
 0x991   :  { %v671_v30 = vpop.permute.xlu1 %670 }
 0x992   :  { %1718 = vmatmul.mubr.msk.bf16.vlgmr.msra.gmra.mrb[16].mxu0 %vm282_vm4, %v596_v29  ;;  %1726 = vmatmul.mubr.msk.bf16.vlgmr.msra.gmra.mrb[12].mxu1 %vm173_vm3, %v671_v30 }
 0x993   :  { %1730 = vmatpush3.bf16.msra.mxu1 %v2057_v31  ;;  %1742 = vmatpush3.bf16.msra.mxu0 %v2007_v3 }
 0x994   :  { %1731 = vmatprep.subr.bf16.mxu1 %v1947_v1  ;;  %1743 = vmatprep.subr.bf16.mxu0 %v1947_v1 }
 0x995   :  { %1737 = vmatprep.mubr.msk.bf16.mxu1 %vm1948_vm2, %v1947_v1  ;;  %1745 = vmatprep.mubr.msk.bf16.mxu0 %vm1948_vm2, %v1947_v1 }
 0x997   :  { %1732 = vmatpush3.bf16.msra.mxu1 %v2064_v32  ;;  %1744 = vmatpush3.bf16.msra.mxu0 %v2022_v6 }
 0x998   :  { %1733 = vmatprep.subr.bf16.mxu1 %v1947_v1  ;;  %1749 = vmatprep.subr.bf16.mxu0 %v1947_v1 }
 0x99b   :  { %1734 = vmatpush3.bf16.msra.mxu1 %v2074_v35 }
 0x99c   :  { %1735 = vmatprep.subr.bf16.mxu1 %v1947_v1 }
 0x99f   :  { %1736 = vmatpush3.bf16.msra.mxu1 %v2083_v36 }
 0x9a0   :  { %1761 = vmatprep.subr.bf16.mxu1 %v1947_v1 }
 0xa65   :  { %v634_v34 = vpop.f32.mrb[16].mxu0  ;;  %v709_v37 = vpop.f32.mrb[12].mxu1 }
 0xa66   :  { %v635_v38 = vadd.f32 %v2126_v49, %v634_v34  ;;  %v1719_v39 = vpop.f32.mrb[17].mxu0  ;;  %v715_v44 = vadd.f32 %v709_v37, %v129_v33  ;;  %v1727_v45 = vpop.f32.mrb[13].mxu1 }
 0xa67   :  { %v637_v46 = vpop.f32.mrb[18].mxu0  ;;  %v712_v47 = vpop.f32.mrb[14].mxu1 }
 0xa68   :  { %647 = vrot.lane.b32.xlu0 %v635_v38, %s1950_s15  ;;  %v1720_v48 = vpop.f32.mrb[19].mxu0  ;;  %723 = vrot.lane.b32.xlu1 %v715_v44, %s1950_s15  ;;  %v1728_v50 = vpop.f32.mrb[15].mxu1  ;;  %v1554_v51 = vmul.f32 -1.442695, %v635_v38  ;;  %v1556_v52 = vmul.f32 -1.442695, %v715_v44 }
 0xa6a   :  { %1878 = vpow2.f32 %v1554_v51 }
 0xa6b   :  { %1880 = vpow2.f32 %v1556_v52 }
 0xa74   :  { %v1879_v12 = vpop.eup %1878 }
 0xa75   :  { %v1881_v53 = vpop.eup %1880  ;;  %v643_v54 = vadd.f32 1.0, %v1879_v12 }
 0xa76   :  { %v719_v55 = vadd.f32 1.0, %v1881_v53 }
 0xa77   :  { %1882 = vrcp.f32 %v643_v54 }
 0xa78   :  { %1884 = vrcp.f32 %v719_v55 }
 0xa81   :  { %v1883_v56 = vpop.eup %1882 }
 0xa82   :  { %v1885_v57 = vpop.eup %1884 }
 0xada   :  { %v648_v9 = vpop.permute.xlu0 %647  ;;  %v724_v58 = vpop.permute.xlu1 %723 }
 0xadb   :  { %v650_v59 = vmul.f32 %v1883_v56, %v648_v9  ;;  %v726_v60 = vmul.f32 %v1885_v57, %v724_v58 }
 0xadd   :  { %652 = vrot.lane.b32.xlu0 %v650_v59, %s1951_s16  ;;  %728 = vrot.lane.b32.xlu1 %v726_v60, %s1951_s16 }
 0xb4f   :  { %v653_v61 = vpop.permute.xlu0 %652  ;;  %v729_v62 = vpop.permute.xlu1 %728 }
 0xb50   :  { %v655_v63 = vadd.f32 %v653_v61, %v635_v38  ;;  %v731_v0 = vadd.f32 %v729_v62, %v715_v44 }
 0xb52   :  { %1886 = vtanh.f32 %v655_v63 }
 0xb53   :  { %1888 = vtanh.f32 %v731_v0 }
 0xb5c   :  { %v1887_v2 = vpop.eup %1886 }
 0xb5d   :  { %v1889_v4 = vpop.eup %1888  ;;  %v657_v5 = vsub.f32 %v2183_v24, %v1887_v2 }
 0xb5e   :  { %v733_v7 = vsub.f32 %v2181_v22, %v1889_v4 }
 0xb5f   :  { %659 = vrot.lane.b32.xlu0 %v657_v5, %s1952_s17 }
 0xb60   :  { %735 = vrot.lane.b32.xlu1 %v733_v7, %s1952_s17 }
 0xbd1   :  { %v660_v10 = vpop.permute.xlu0 %659 }
 0xbd2   :  { %v662_v11 = vmul.f32 %v1883_v56, %v660_v10  ;;  %v736_v13 = vpop.permute.xlu1 %735 }
 0xbd3   :  { %v738_v14 = vmul.f32 %v1885_v57, %v736_v13 }
 0xbd4   :  { %664 = vrot.lane.b32.xlu0 %v662_v11, %s1950_s15 }
 0xbd5   :  { %740 = vrot.lane.b32.xlu1 %v738_v14, %s1950_s15 }
 0xc46   :  { %v665_v15 = vpop.permute.xlu0 %664 }
 0xc47   :  { %v2224_v16 = vadd.f32 %v1887_v2, %v665_v15  ;;  %v741_v17 = vpop.permute.xlu1 %740 }
 0xc48   :  { %v2226_v18 = vadd.f32 %v1889_v4, %v741_v17 }
 0xc49   :  { %749 = vrot.lane.b32.xlu1 %v2224_v16, %s1952_s17 }
 0xc4a   :  { %745 = vrot.lane.b32.xlu0 %v2226_v18, %s1951_s16  ;;  %v825_v19 = vpack.c.bf16 %v2226_v18, %v2226_v18 }
 0xc4e   :  { %827 = vrot.lane.b32.xlu0 %v825_v19, %s1951_s16 }
 0xcbb   :  { %v750_v20 = vpop.permute.xlu1 %749 }
 0xcbc   :  { %v746_v21 = vpop.permute.xlu0 %745 }
 0xcbd   :  { %v752_v22 = vsel %vm173_vm3, %v746_v21, %v750_v20 }
 0xcbe   :  { %v753_v23 = vpack.c.bf16 %v752_v22, %v752_v22 }
 0xcc0   :  { %v828_v24 = vpop.permute.xlu0 %827  ;;  %1738 = vmatmul.mubr.msk.bf16.vlgmr.msra.gmra.mrb[16].mxu1 %vm282_vm4, %v753_v23 }
 0xcc1   :  { %1746 = vmatmul.mubr.msk.bf16.vlgmr.msra.gmra.mrb[20].mxu0 %vm173_vm3, %v828_v24  ;;  %1762 = vmatpush3.bf16.msra.mxu1 %v2007_v3 }
 0xcc2   :  { %1750 = vmatpush3.bf16.msra.mxu0 %v2057_v31  ;;  %1763 = vmatprep.subr.bf16.mxu1 %v1947_v1 }
 0xcc3   :  { %1751 = vmatprep.subr.bf16.mxu0 %v1947_v1  ;;  %1757 = vmatprep.mubr.msk.bf16.mxu0 %vm1948_vm2, %v1947_v1 }
 0xcc4   :  { %1765 = vmatprep.mubr.msk.bf16.mxu1 %vm1948_vm2, %v1947_v1 }
 0xcc5   :  { %1764 = vmatpush3.bf16.msra.mxu1 %v2022_v6 }
 0xcc6   :  { %1752 = vmatpush3.bf16.msra.mxu0 %v2064_v32  ;;  %1769 = vmatprep.subr.bf16.mxu1 %v1947_v1 }
 0xcc7   :  { %1753 = vmatprep.subr.bf16.mxu0 %v1947_v1 }
 0xcca   :  { %1754 = vmatpush3.bf16.msra.mxu0 %v2074_v35 }
 0xccb   :  { %1755 = vmatprep.subr.bf16.mxu0 %v1947_v1 }
 0xcce   :  { %1756 = vmatpush3.bf16.msra.mxu0 %v2083_v36 }
 0xccf   :  { %1781 = vmatprep.subr.bf16.mxu0 %v1947_v1 }
 0xd93   :  { %v791_v26 = vpop.f32.mrb[16].mxu1 }
 0xd94   :  { %v792_v27 = vadd.f32 %v2126_v49, %v791_v26  ;;  %v1739_v28 = vpop.f32.mrb[17].mxu1  ;;  %v866_v29 = vpop.f32.mrb[20].mxu0 }
 0xd95   :  { %v872_v30 = vadd.f32 %v866_v29, %v134_v25  ;;  %v794_v33 = vpop.f32.mrb[18].mxu1  ;;  %v1747_v34 = vpop.f32.mrb[21].mxu0 }
 0xd96   :  { %v869_v37 = vpop.f32.mrb[22].mxu0  ;;  %804 = vrot.lane.b32.xlu1 %v792_v27, %s1950_s15  ;;  %v1740_v38 = vpop.f32.mrb[19].mxu1  ;;  %v1558_v44 = vmul.f32 -1.442695, %v792_v27 }
 0xd97   :  { %880 = vrot.lane.b32.xlu0 %v872_v30, %s1950_s15  ;;  %v1748_v39 = vpop.f32.mrb[23].mxu0  ;;  %v1560_v45 = vmul.f32 -1.442695, %v872_v30 }
 0xd98   :  { %1890 = vpow2.f32 %v1558_v44 }
 0xd99   :  { %1892 = vpow2.f32 %v1560_v45 }
 0xda2   :  { %v1891_v41 = vpop.eup %1890 }
 0xda3   :  { %v1893_v46 = vpop.eup %1892  ;;  %v800_v47 = vadd.f32 1.0, %v1891_v41 }
 0xda4   :  { %v876_v48 = vadd.f32 1.0, %v1893_v46 }
 0xda5   :  { %1894 = vrcp.f32 %v800_v47 }
 0xda6   :  { %1896 = vrcp.f32 %v876_v48 }
 0xdaf   :  { %v1895_v50 = vpop.eup %1894 }
 0xdb0   :  { %v1897_v52 = vpop.eup %1896 }
 0xe08   :  { %v805_v51 = vpop.permute.xlu1 %804 }
 0xe09   :  { %v807_v12 = vmul.f32 %v1895_v50, %v805_v51  ;;  %v881_v53 = vpop.permute.xlu0 %880 }
 0xe0a   :  { %v883_v54 = vmul.f32 %v1897_v52, %v881_v53 }
 0xe0b   :  { %809 = vrot.lane.b32.xlu1 %v807_v12, %s1951_s16 }
 0xe0c   :  { %885 = vrot.lane.b32.xlu0 %v883_v54, %s1951_s16 }
 0xe7d   :  { %v810_v55 = vpop.permute.xlu1 %809 }
 0xe7e   :  { %v812_v56 = vadd.f32 %v810_v55, %v792_v27  ;;  %v886_v57 = vpop.permute.xlu0 %885 }
 0xe7f   :  { %v888_v9 = vadd.f32 %v886_v57, %v872_v30 }
 0xe80   :  { %1898 = vtanh.f32 %v812_v56 }
 0xe81   :  { %1900 = vtanh.f32 %v888_v9 }
 0xe8a   :  { %v1899_v58 = vpop.eup %1898 }
 0xe8b   :  { %v1901_v59 = vpop.eup %1900  ;;  %v814_v60 = vsub.f32 %v2224_v16, %v1899_v58 }
 0xe8c   :  { %v890_v61 = vsub.f32 %v2226_v18, %v1901_v59  ;;  %v137_v18 = vadd.f32 %v2036_v8, %v2100_v43 }
 0xe8d   :  { %816 = vrot.lane.b32.xlu1 %v814_v60, %s1952_s17 }
 0xe8e   :  { %892 = vrot.lane.b32.xlu0 %v890_v61, %s1952_s17 }
 0xeff   :  { %v817_v62 = vpop.permute.xlu1 %816 }
 0xf00   :  { %v819_v63 = vmul.f32 %v1895_v50, %v817_v62  ;;  %v893_v0 = vpop.permute.xlu0 %892 }
 0xf01   :  { %v895_v2 = vmul.f32 %v1897_v52, %v893_v0 }
 0xf02   :  { %821 = vrot.lane.b32.xlu1 %v819_v63, %s1950_s15 }
 0xf03   :  { %897 = vrot.lane.b32.xlu0 %v895_v2, %s1950_s15 }
 0xf74   :  { %v822_v4 = vpop.permute.xlu1 %821 }
 0xf75   :  { %v2267_v5 = vadd.f32 %v1899_v58, %v822_v4  ;;  %v898_v7 = vpop.permute.xlu0 %897 }
 0xf76   :  { %v2269_v10 = vadd.f32 %v1901_v59, %v898_v7 }
 0xf77   :  { %906 = vrot.lane.b32.xlu0 %v2267_v5, %s1952_s17 }
 0xf78   :  { %902 = vrot.lane.b32.xlu1 %v2269_v10, %s1951_s16  ;;  %v982_v11 = vpack.c.bf16 %v2269_v10, %v2269_v10 }
 0xf7c   :  { %984 = vrot.lane.b32.xlu1 %v982_v11, %s1951_s16 }
 0xfe9   :  { %v907_v13 = vpop.permute.xlu0 %906 }
 0xfea   :  { %v903_v14 = vpop.permute.xlu1 %902 }
 0xfeb   :  { %v909_v15 = vsel %vm173_vm3, %v903_v14, %v907_v13 }
 0xfec   :  { %v910_v16 = vpack.c.bf16 %v909_v15, %v909_v15 }
 0xfee   :  { %1758 = vmatmul.mubr.msk.bf16.vlgmr.msra.gmra.mrb[24].mxu0 %vm282_vm4, %v910_v16  ;;  %v985_v17 = vpop.permute.xlu1 %984 }
 0xfef   :  { %1766 = vmatmul.mubr.msk.bf16.vlgmr.msra.gmra.mrb[20].mxu1 %vm173_vm3, %v985_v17  ;;  %1782 = vmatpush3.bf16.msra.mxu0 %v2007_v3 }
 0xff0   :  { %1770 = vmatpush3.bf16.msra.mxu1 %v2057_v31  ;;  %1783 = vmatprep.subr.bf16.mxu0 %v1947_v1 }
 0xff1   :  { %1771 = vmatprep.subr.bf16.mxu1 %v1947_v1  ;;  %1777 = vmatprep.mubr.msk.bf16.mxu1 %vm1948_vm2, %v1947_v1 }
 0xff2   :  { %1785 = vmatprep.mubr.msk.bf16.mxu0 %vm1948_vm2, %v1947_v1 }
 0xff3   :  { %1784 = vmatpush3.bf16.msra.mxu0 %v2022_v6 }
 0xff4   :  { %1772 = vmatpush3.bf16.msra.mxu1 %v2064_v32  ;;  %1789 = vmatprep.subr.bf16.mxu0 %v1947_v1 }
 0xff5   :  { %1773 = vmatprep.subr.bf16.mxu1 %v1947_v1 }
 0xff8   :  { %1774 = vmatpush3.bf16.msra.mxu1 %v2074_v35 }
 0xff9   :  { %1775 = vmatprep.subr.bf16.mxu1 %v1947_v1 }
 0xffc   :  { %1776 = vmatpush3.bf16.msra.mxu1 %v2083_v36 }
 0xffd   :  { %1801 = vmatprep.subr.bf16.mxu1 %v1947_v1 }
0x10c1   :  { %v948_v19 = vpop.f32.mrb[24].mxu0 }
0x10c2   :  { %v949_v20 = vadd.f32 %v2126_v49, %v948_v19  ;;  %v1759_v21 = vpop.f32.mrb[25].mxu0  ;;  %v1023_v22 = vpop.f32.mrb[20].mxu1 }
0x10c3   :  { %v1029_v23 = vadd.f32 %v1023_v22, %v137_v18  ;;  %v951_v24 = vpop.f32.mrb[26].mxu0  ;;  %v1767_v25 = vpop.f32.mrb[21].mxu1 }
0x10c4   :  { %961 = vrot.lane.b32.xlu0 %v949_v20, %s1950_s15  ;;  %v1760_v26 = vpop.f32.mrb[27].mxu0  ;;  %v1026_v27 = vpop.f32.mrb[22].mxu1  ;;  %v1562_v29 = vmul.f32 -1.442695, %v949_v20 }
0x10c5   :  { %1037 = vrot.lane.b32.xlu1 %v1029_v23, %s1950_s15  ;;  %v1768_v28 = vpop.f32.mrb[23].mxu1  ;;  %v1564_v30 = vmul.f32 -1.442695, %v1029_v23 }
0x10c6   :  { %1902 = vpow2.f32 %v1562_v29 }
0x10c7   :  { %1904 = vpow2.f32 %v1564_v30 }
0x10d0   :  { %v1903_v43 = vpop.eup %1902 }
0x10d1   :  { %v1905_v33 = vpop.eup %1904  ;;  %v957_v34 = vadd.f32 1.0, %v1903_v43 }
0x10d2   :  { %v1033_v37 = vadd.f32 1.0, %v1905_v33 }
0x10d3   :  { %1906 = vrcp.f32 %v957_v34 }
0x10d4   :  { %1908 = vrcp.f32 %v1033_v37 }
0x10dd   :  { %v1907_v38 = vpop.eup %1906 }
0x10de   :  { %v1909_v44 = vpop.eup %1908 }
0x1136   :  { %v962_v39 = vpop.permute.xlu0 %961 }
0x1137   :  { %v964_v45 = vmul.f32 %v1907_v38, %v962_v39  ;;  %v1038_v41 = vpop.permute.xlu1 %1037 }
0x1138   :  { %v1040_v46 = vmul.f32 %v1909_v44, %v1038_v41 }
0x1139   :  { %966 = vrot.lane.b32.xlu0 %v964_v45, %s1951_s16 }
0x113a   :  { %1042 = vrot.lane.b32.xlu1 %v1040_v46, %s1951_s16 }
0x11ab   :  { %v967_v47 = vpop.permute.xlu0 %966 }
0x11ac   :  { %v969_v48 = vadd.f32 %v967_v47, %v949_v20  ;;  %v1043_v50 = vpop.permute.xlu1 %1042 }
0x11ad   :  { %v1045_v51 = vadd.f32 %v1043_v50, %v1029_v23 }
0x11ae   :  { %1910 = vtanh.f32 %v969_v48 }
0x11af   :  { %1912 = vtanh.f32 %v1045_v51 }
0x11b8   :  { %v1911_v52 = vpop.eup %1910 }
0x11b9   :  { %v1913_v12 = vpop.eup %1912  ;;  %v971_v53 = vsub.f32 %v2267_v5, %v1911_v52 }
0x11ba   :  { %v1047_v54 = vsub.f32 %v2269_v10, %v1913_v12 }
0x11bb   :  { %973 = vrot.lane.b32.xlu0 %v971_v53, %s1952_s17 }
0x11bc   :  { %1049 = vrot.lane.b32.xlu1 %v1047_v54, %s1952_s17 }
0x122d   :  { %v974_v55 = vpop.permute.xlu0 %973 }
0x122e   :  { %v976_v56 = vmul.f32 %v1907_v38, %v974_v55  ;;  %v1050_v57 = vpop.permute.xlu1 %1049 }
0x122f   :  { %v1052_v9 = vmul.f32 %v1909_v44, %v1050_v57  ;;  %v1945_v57 = vld [vmem:[%s2424_s3] ss:$0 sm:$0xff] }
0x1230   :  { %978 = vrot.lane.b32.xlu0 %v976_v56, %s1950_s15  ;;  %v1944_v56 = vld [vmem:[%s2425_s4] sm:$0xff]  }
0x1231   :  { %1054 = vrot.lane.b32.xlu1 %v1052_v9, %s1950_s15  ;;  %v145_v9 = vadd.f32 %v1945_v57, %v2098_v42 }
0x12a2   :  { %v979_v58 = vpop.permute.xlu0 %978 }
0x12a3   :  { %v2310_v59 = vadd.f32 %v1911_v52, %v979_v58  ;;  %v1055_v60 = vpop.permute.xlu1 %1054 }
0x12a4   :  { %v2312_v61 = vadd.f32 %v1913_v12, %v1055_v60 }
0x12a5   :  { %1063 = vrot.lane.b32.xlu1 %v2310_v59, %s1952_s17 }
0x12a6   :  { %1059 = vrot.lane.b32.xlu0 %v2312_v61, %s1951_s16  ;;  %v1139_v62 = vpack.c.bf16 %v2312_v61, %v2312_v61 }
0x12aa   :  { %1141 = vrot.lane.b32.xlu0 %v1139_v62, %s1951_s16 }
0x1317   :  { %v1064_v63 = vpop.permute.xlu1 %1063 }
0x1318   :  { %v1060_v0 = vpop.permute.xlu0 %1059 }
0x1319   :  { %v1066_v2 = vsel %vm173_vm3, %v1060_v0, %v1064_v63 }
0x131a   :  { %v1067_v4 = vpack.c.bf16 %v1066_v2, %v1066_v2 }
0x131c   :  { %v1142_v5 = vpop.permute.xlu0 %1141  ;;  %1778 = vmatmul.mubr.msk.bf16.vlgmr.msra.gmra.mrb[24].mxu1 %vm282_vm4, %v1067_v4 }
0x131d   :  { %1786 = vmatmul.mubr.msk.bf16.vlgmr.msra.gmra.mrb[28].mxu0 %vm173_vm3, %v1142_v5  ;;  %1802 = vmatpush3.bf16.msra.mxu1 %v2007_v3  ;;  %v142_v3 = vadd.f32 %v2094_v40, %v2036_v8 }
0x131e   :  { %1790 = vmatpush3.bf16.msra.mxu0 %v2057_v31  ;;  %1803 = vmatprep.subr.bf16.mxu1 %v1947_v1 }
0x131f   :  { %1791 = vmatprep.subr.bf16.mxu0 %v1947_v1  ;;  %1797 = vmatprep.mubr.msk.bf16.mxu0 %vm1948_vm2, %v1947_v1 }
0x1320   :  { %1805 = vmatprep.mubr.msk.bf16.mxu1 %vm1948_vm2, %v1947_v1 }
0x1321   :  { %1804 = vmatpush3.bf16.msra.mxu1 %v2022_v6 }
0x1322   :  { %1792 = vmatpush3.bf16.msra.mxu0 %v2064_v32  ;;  %1809 = vmatprep.subr.bf16.mxu1 %v1947_v1 }
0x1323   :  { %1793 = vmatprep.subr.bf16.mxu0 %v1947_v1 }
0x1326   :  { %1794 = vmatpush3.bf16.msra.mxu0 %v2074_v35 }
0x1327   :  { %1795 = vmatprep.subr.bf16.mxu0 %v1947_v1 }
0x132a   :  { %1796 = vmatpush3.bf16.msra.mxu0 %v2083_v36 }
0x132b   :  { %1821 = vmatprep.subr.bf16.mxu0 %v1947_v1 }
0x13ef   :  { %v1105_v31 = vpop.f32.mrb[24].mxu1 }
0x13f0   :  { %v1106_v6 = vadd.f32 %v2126_v49, %v1105_v31  ;;  %v1779_v7 = vpop.f32.mrb[25].mxu1  ;;  %v1180_v10 = vpop.f32.mrb[28].mxu0 }
0x13f1   :  { %v1186_v11 = vadd.f32 %v1180_v10, %v142_v3  ;;  %v1108_v13 = vpop.f32.mrb[26].mxu1  ;;  %v1787_v14 = vpop.f32.mrb[29].mxu0 }
0x13f2   :  { %v1183_v15 = vpop.f32.mrb[30].mxu0  ;;  %1118 = vrot.lane.b32.xlu1 %v1106_v6, %s1950_s15  ;;  %v1780_v16 = vpop.f32.mrb[27].mxu1  ;;  %v1566_v18 = vmul.f32 -1.442695, %v1106_v6 }
0x13f3   :  { %1194 = vrot.lane.b32.xlu0 %v1186_v11, %s1950_s15  ;;  %v1788_v17 = vpop.f32.mrb[31].mxu0  ;;  %v1568_v19 = vmul.f32 -1.442695, %v1186_v11 }
0x13f4   :  { %1914 = vpow2.f32 %v1566_v18 }
0x13f5   :  { %1916 = vpow2.f32 %v1568_v19 }
0x13fe   :  { %v1915_v8 = vpop.eup %1914 }
0x13ff   :  { %v1917_v40 = vpop.eup %1916  ;;  %v1114_v20 = vadd.f32 1.0, %v1915_v8 }
0x1400   :  { %v1190_v21 = vadd.f32 1.0, %v1917_v40 }
0x1401   :  { %1918 = vrcp.f32 %v1114_v20 }
0x1402   :  { %1920 = vrcp.f32 %v1190_v21 }
0x140b   :  { %v1919_v22 = vpop.eup %1918 }
0x140c   :  { %v1921_v24 = vpop.eup %1920 }
0x1464   :  { %v1119_v23 = vpop.permute.xlu1 %1118 }
0x1465   :  { %v1121_v25 = vmul.f32 %v1919_v22, %v1119_v23  ;;  %v1195_v26 = vpop.permute.xlu0 %1194 }
0x1466   :  { %v1197_v27 = vmul.f32 %v1921_v24, %v1195_v26 }
0x1467   :  { %1123 = vrot.lane.b32.xlu1 %v1121_v25, %s1951_s16 }
0x1468   :  { %1199 = vrot.lane.b32.xlu0 %v1197_v27, %s1951_s16 }
0x14d9   :  { %v1124_v28 = vpop.permute.xlu1 %1123 }
0x14da   :  { %v1126_v29 = vadd.f32 %v1124_v28, %v1106_v6  ;;  %v1200_v30 = vpop.permute.xlu0 %1199 }
0x14db   :  { %v1202_v43 = vadd.f32 %v1200_v30, %v1186_v11 }
0x14dc   :  { %1922 = vtanh.f32 %v1126_v29 }
0x14dd   :  { %1924 = vtanh.f32 %v1202_v43 }
0x14e6   :  { %v1923_v33 = vpop.eup %1922 }
0x14e7   :  { %v1925_v34 = vpop.eup %1924  ;;  %v1128_v37 = vsub.f32 %v2310_v59, %v1923_v33 }
0x14e8   :  { %v1204_v38 = vsub.f32 %v2312_v61, %v1925_v34 }
0x14e9   :  { %1130 = vrot.lane.b32.xlu1 %v1128_v37, %s1952_s17 }
0x14ea   :  { %1206 = vrot.lane.b32.xlu0 %v1204_v38, %s1952_s17 }
0x155b   :  { %v1131_v39 = vpop.permute.xlu1 %1130 }
0x155c   :  { %v1133_v44 = vmul.f32 %v1919_v22, %v1131_v39  ;;  %v1207_v45 = vpop.permute.xlu0 %1206 }
0x155d   :  { %v1209_v41 = vmul.f32 %v1921_v24, %v1207_v45 }
0x155e   :  { %1135 = vrot.lane.b32.xlu1 %v1133_v44, %s1950_s15 }
0x155f   :  { %1211 = vrot.lane.b32.xlu0 %v1209_v41, %s1950_s15 }
0x15d0   :  { %v1136_v46 = vpop.permute.xlu1 %1135 }
0x15d1   :  { %v2353_v47 = vadd.f32 %v1923_v33, %v1136_v46  ;;  %v1212_v48 = vpop.permute.xlu0 %1211 }
0x15d2   :  { %v2355_v50 = vadd.f32 %v1925_v34, %v1212_v48  ;;  %v1946_v34 = vld [vmem:[%s2426_s5] ss:$0 sm:$0xff] }
0x15d3   :  { %1220 = vrot.lane.b32.xlu0 %v2353_v47, %s1952_s17 }
0x15d4   :  { %1216 = vrot.lane.b32.xlu1 %v2355_v50, %s1951_s16  ;;  %v1296_v51 = vpack.c.bf16 %v2355_v50, %v2355_v50 }
0x15d8   :  { %1298 = vrot.lane.b32.xlu1 %v1296_v51, %s1951_s16 }
0x1645   :  { %v1221_v52 = vpop.permute.xlu0 %1220 }
0x1646   :  { %v1217_v12 = vpop.permute.xlu1 %1216 }
0x1647   :  { %v1223_v53 = vsel %vm173_vm3, %v1217_v12, %v1221_v52 }
0x1648   :  { %v1224_v54 = vpack.c.bf16 %v1223_v53, %v1223_v53 }
0x164a   :  { %1798 = vmatmul.mubr.msk.bf16.vlgmr.msra.gmra.mrb[32].mxu0 %vm282_vm4, %v1224_v54  ;;  %v1299_v55 = vpop.permute.xlu1 %1298  ;;  %v1846_v54 = vld [vmem:[%s2427_s6] sm:$0xff]  }
0x164b   :  { %1806 = vmatmul.mubr.msk.bf16.vlgmr.msra.gmra.mrb[28].mxu1 %vm173_vm3, %v1299_v55  ;;  %1825 = vmatprep.mubr.msk.bf16.mxu0 %vm1948_vm2, %v1947_v1  ;;  %v1847_v55 = vld [vmem:[%s2427_s6 + $0x8] sm:$0xff]  }
0x164c   :  { %1810 = vmatpush3.bf16.msra.mxu1 %v1944_v56  ;;  %1817 = vmatprep.mubr.msk.bf16.mxu1 %vm1948_vm2, %v1947_v1 }
0x164d   :  { %1811 = vmatprep.subr.bf16.mxu1 %v1947_v1  ;;  %1822 = vmatpush3.bf16.msra.mxu0 %v1846_v54 }
0x164e   :  { %1823 = vmatprep.subr.bf16.mxu0 %v1947_v1 }
0x1650   :  { %1812 = vmatpush3.bf16.msra.mxu1 %v2064_v32 }
0x1651   :  { %1813 = vmatprep.subr.bf16.mxu1 %v1947_v1  ;;  %1824 = vmatpush3.bf16.msra.mxu0 %v1847_v55 }
0x1654   :  { %1814 = vmatpush3.bf16.msra.mxu1 %v2074_v35 }
0x1655   :  { %1815 = vmatprep.subr.bf16.mxu1 %v1947_v1 }
0x1658   :  { %1816 = vmatpush3.bf16.msra.mxu1 %v2083_v36 }
0x171d   :  { %v1262_v58 = vpop.f32.mrb[32].mxu0 }
0x171e   :  { %v1263_v59 = vadd.f32 %v2126_v49, %v1262_v58  ;;  %v1799_v60 = vpop.f32.mrb[33].mxu0  ;;  %v1337_v61 = vpop.f32.mrb[28].mxu1 }
0x171f   :  { %v1343_v32 = vadd.f32 %v1337_v61, %v145_v9  ;;  %v1265_v62 = vpop.f32.mrb[34].mxu0  ;;  %v1807_v63 = vpop.f32.mrb[29].mxu1  ;;  %v1575_v61 = vld [vmem:[%s2428_s7] ss:$0 sm:$0xff] }
0x1720   :  { %1275 = vrot.lane.b32.xlu0 %v1263_v59, %s1950_s15  ;;  %v1800_v35 = vpop.f32.mrb[35].mxu0  ;;  %v1340_v0 = vpop.f32.mrb[30].mxu1  ;;  %v1570_v2 = vmul.f32 -1.442695, %v1263_v59 }
0x1721   :  { %1351 = vrot.lane.b32.xlu1 %v1343_v32, %s1950_s15  ;;  %v1808_v36 = vpop.f32.mrb[31].mxu1  ;;  %v1572_v4 = vmul.f32 -1.442695, %v1343_v32 }
0x1722   :  { %1926 = vpow2.f32 %v1570_v2 }
0x1723   :  { %1928 = vpow2.f32 %v1572_v4 }
0x172c   :  { %v1927_v42 = vpop.eup %1926 }
0x172d   :  { %v1929_v5 = vpop.eup %1928  ;;  %v1271_v3 = vadd.f32 1.0, %v1927_v42 }
0x172e   :  { %v1347_v49 = vadd.f32 1.0, %v1929_v5 }
0x172f   :  { %1930 = vrcp.f32 %v1271_v3 }
0x1730   :  { %1932 = vrcp.f32 %v1347_v49 }
0x1739   :  { %v1931_v31 = vpop.eup %1930 }
0x173a   :  { %v1933_v7 = vpop.eup %1932 }
0x1792   :  { %v1276_v6 = vpop.permute.xlu0 %1275 }
0x1793   :  { %v1278_v10 = vmul.f32 %v1931_v31, %v1276_v6  ;;  %v1352_v11 = vpop.permute.xlu1 %1351 }
0x1794   :  { %v1354_v13 = vmul.f32 %v1933_v7, %v1352_v11 }
0x1795   :  { %1280 = vrot.lane.b32.xlu0 %v1278_v10, %s1951_s16 }
0x1796   :  { %1356 = vrot.lane.b32.xlu1 %v1354_v13, %s1951_s16 }
0x1807   :  { %v1281_v14 = vpop.permute.xlu0 %1280 }
0x1808   :  { %v1283_v15 = vadd.f32 %v1281_v14, %v1263_v59  ;;  %v1357_v16 = vpop.permute.xlu1 %1356 }
0x1809   :  { %v1359_v17 = vadd.f32 %v1357_v16, %v1343_v32 }
0x180a   :  { %1934 = vtanh.f32 %v1283_v15 }
0x180b   :  { %1936 = vtanh.f32 %v1359_v17 }
0x1814   :  { %v1935_v18 = vpop.eup %1934 }
0x1815   :  { %v1937_v19 = vpop.eup %1936  ;;  %v1285_v8 = vsub.f32 %v2353_v47, %v1935_v18 }
0x1816   :  { %v1361_v40 = vsub.f32 %v2355_v50, %v1937_v19 }
0x1817   :  { %1287 = vrot.lane.b32.xlu0 %v1285_v8, %s1952_s17 }
0x1818   :  { %1363 = vrot.lane.b32.xlu1 %v1361_v40, %s1952_s17 }
0x1889   :  { %v1288_v20 = vpop.permute.xlu0 %1287 }
0x188a   :  { %v1290_v21 = vmul.f32 %v1931_v31, %v1288_v20  ;;  %v1364_v22 = vpop.permute.xlu1 %1363 }
0x188b   :  { %v1366_v23 = vmul.f32 %v1933_v7, %v1364_v22 }
0x188c   :  { %1292 = vrot.lane.b32.xlu0 %v1290_v21, %s1950_s15 }
0x188d   :  { %1368 = vrot.lane.b32.xlu1 %v1366_v23, %s1950_s15 }
0x18fe   :  { %v1293_v24 = vpop.permute.xlu0 %1292 }
0x18ff   :  { %v1295_v25 = vadd.f32 %v1935_v18, %v1293_v24  ;;  %v1369_v26 = vpop.permute.xlu1 %1368 }
0x1900   :  { %v1371_v27 = vadd.f32 %v1937_v19, %v1369_v26 }
0x1901   :  { %1377 = vrot.lane.b32.xlu1 %v1295_v25, %s1952_s17 }
0x1902   :  { %1373 = vrot.lane.b32.xlu0 %v1371_v27, %s1951_s16 }
0x1973   :  { %v1378_v28 = vpop.permute.xlu1 %1377 }
0x1974   :  { %v1374_v29 = vpop.permute.xlu0 %1373 }
0x1975   :  { %v1380_v30 = vsel %vm173_vm3, %v1374_v29, %v1378_v28 }
0x1976   :  { %v1381_v43 = vpack.c.bf16 %v1380_v30, %v1380_v30 }
0x1978   :  { %1818 = vmatmul.mubr.msk.bf16.vlgmr.msra.gmra.mrb[32].mxu1 %vm282_vm4, %v1381_v43 }
0x1a4b   :  { %v1419_v33 = vpop.f32.mrb[32].mxu1 }
0x1a4c   :  { %v1420_v37 = vadd.f32 %v1946_v34, %v1419_v33  ;;  %v1819_v38 = vpop.f32.mrb[33].mxu1 }
0x1a4d   :  { %v1422_v39 = vpop.f32.mrb[34].mxu1 }
0x1a4e   :  { %1432 = vrot.lane.b32.xlu0 %v1420_v37, %s1950_s15  ;;  %v1820_v44 = vpop.f32.mrb[35].mxu1  ;;  %v1574_v45 = vmul.f32 -1.442695, %v1420_v37 }
0x1a50   :  { %1938 = vpow2.f32 %v1574_v45 }
0x1a5a   :  { %v1939_v41 = vpop.eup %1938 }
0x1a5b   :  { %v1428_v46 = vadd.f32 1.0, %v1939_v41 }
0x1a5d   :  { %1940 = vrcp.f32 %v1428_v46 }
0x1a67   :  { %v1941_v47 = vpop.eup %1940 }
0x1ac0   :  { %v1433_v48 = vpop.permute.xlu0 %1432 }
0x1ac1   :  { %v1435_v50 = vmul.f32 %v1941_v47, %v1433_v48 }
0x1ac3   :  { %1437 = vrot.lane.b32.xlu1 %v1435_v50, %s1951_s16 }
0x1b35   :  { %v1438_v51 = vpop.permute.xlu1 %1437 }
0x1b36   :  { %v1440_v52 = vadd.f32 %v1438_v51, %v1420_v37 }
0x1b38   :  { %1942 = vtanh.f32 %v1440_v52 }
0x1b42   :  { %v1943_v12 = vpop.eup %1942 }
0x1b43   :  { %v1442_v53 = vsub.f32 %v1295_v25, %v1943_v12 }
0x1b45   :  { %1444 = vrot.lane.b32.xlu0 %v1442_v53, %s1952_s17 }
0x1bb7   :  { %v1445_v56 = vpop.permute.xlu0 %1444 }
0x1bb8   :  { %v1447_v57 = vmul.f32 %v1941_v47, %v1445_v56 }
0x1bba   :  { %1449 = vrot.lane.b32.xlu1 %v1447_v57, %s1950_s15 }
0x1c2c   :  { %v1450_v9 = vpop.permute.xlu1 %1449 }
0x1c2d   :  { %v1452_v58 = vadd.f32 %v1943_v12, %v1450_v9 }
0x1c2f   :  { %v1453_v59 = vpack.c.bf16 %v1452_v58, %v1452_v58 }
0x1c31   :  { %1466 = vrot.lane.b32.xlu0 %v1453_v59, %s1951_s16 }
0x1ca3   :  { %v1467_v60 = vpop.permute.xlu0 %1466 }
0x1ca4   :  { %1826 = vmatmul.mubr.msk.bf16.vlgmr.msra.gmra.mrb[36].mxu0 %vm173_vm3, %v1467_v60 }
0x1d77   :  { %v1517_v32 = vpop.f32.mrb[36].mxu0 }
0x1d78   :  { %v1518_v62 = vadd.f32 %v1575_v61, %v1517_v32  ;;  %v1827_v1 = vpop.f32.mrb[37].mxu0 }
0x1d79   :  { %v1520_v63 = vpop.f32.mrb[38].mxu0 }
0x1d7a   :  { %1523 = vst [vmem:[%s2429_s8] sm:$0xff] %v1518_v62  ;;  %v1828_v35 = vpop.f32.mrb[39].mxu0 }

</bundles_post_ra>
